<compile_context>
chip_gen: v5e
topology: v5e:2x2
jax: 0.10.0
libtpu: 0.0.40
codegen_flags: <defaults>
</compile_context>

<pallas_src>
import functools
import math

import jax
import jax.numpy as jnp
from jax import lax
from jax.experimental import pallas as pl
from jax.experimental.pallas import tpu as pltpu

_EPS7 = 1e-7   # eps used by bbox_iou / cost_distance in the reference
_EPS9 = 1e-9   # eps used by select_candidates_in_gts


def _ipow(x, p):
    """x**p with a square-and-multiply fast path for small positive integer p."""
    p = float(p)
    if p == 1.0:
        return x
    if p == int(p) and p >= 1:
        n = int(p)
        result = None
        base = x
        while n:
            if n & 1:
                result = base if result is None else result * base
            n >>= 1
            if n:
                base = base * base
        return result
    return jnp.power(x, p)


def _tal_kernel(scores_ref, pdb_ref, anc_ref, atp_ref, gpk_ref,
                tl_ref, tb_ref, ts_ref, fg_ref,
                *, topk, alpha, beta, eps, approx_recip, packed_topk):
    """One grid step = Bblk independent batch elements, anchors on lanes."""

    def rcp(x):
        # approx reciprocal lowers to the (otherwise idle) EUP slot; exact path
        # available via use_approx_reciprocal=False for bit-level parity tests.
        return pl.reciprocal(x, approx=True) if approx_recip else 1.0 / x

    scores = scores_ref[...]          # (B, C, A) pd_scores (classes on sublanes)
    pdb = pdb_ref[...]                # (B, 4, A) pd_bboxes rows x1,y1,x2,y2
    anc = anc_ref[...]                # (2, A)    anchor centers (x row, y row)
    atp = atp_ref[...]                # (B, 1, A) atan(w_pd / h_pd)
    gpk = gpk_ref[...]                # (B, G, 8) packed gt: x1,y1,x2,y2,label,mask,atan,0

    B, C, A = scores.shape
    G = gpk.shape[1]

    gtb = gpk[:, :, 0:4]              # (B, G, 4)
    labels_f = gpk[:, :, 4:5]         # (B, G, 1) float class ids (exact small ints)
    mgt = gpk[:, :, 5:6]              # (B, G, 1) float gt-valid mask
    atg = gpk[:, :, 6:7]              # (B, G, 1) atan(w_gt / h_gt)

    # ---- box components ------------------------------------------------------
    gx1 = gtb[:, :, 0:1]; gy1 = gtb[:, :, 1:2]        # (B, G, 1)
    gx2 = gtb[:, :, 2:3]; gy2 = gtb[:, :, 3:4]
    px1 = pdb[:, 0:1, :]; py1 = pdb[:, 1:2, :]        # (B, 1, A)
    px2 = pdb[:, 2:3, :]; py2 = pdb[:, 3:4, :]
    ax = anc[0:1, :].reshape(1, 1, A)                  # (1, 1, A)
    ay = anc[1:2, :].reshape(1, 1, A)

    w1 = gx2 - gx1                                     # (B, G, 1)
    h1 = gy2 - gy1 + _EPS7
    w2 = px2 - px1                                     # (B, 1, A)
    h2 = py2 - py1 + _EPS7

    # ---- CIoU (box1 = gt, box2 = pd) -> (B, G, A) ----------------------------
    inter_w = jnp.maximum(jnp.minimum(gx2, px2) - jnp.maximum(gx1, px1), 0.0)
    inter_h = jnp.maximum(jnp.minimum(gy2, py2) - jnp.maximum(gy1, py1), 0.0)
    inter = inter_w * inter_h
    union = w1 * h1 + w2 * h2 - inter + _EPS7
    iou = inter * rcp(union)
    cw = jnp.maximum(gx2, px2) - jnp.minimum(gx1, px1)
    ch = jnp.maximum(gy2, py2) - jnp.minimum(gy1, py1)
    c2 = cw * cw + ch * ch + _EPS7
    dx = px1 + px2 - gx1 - gx2
    dy = py1 + py2 - gy1 - gy2
    rho2 = (dx * dx + dy * dy) * 0.25
    dv = atp - atg
    v = (4.0 / (math.pi ** 2)) * (dv * dv)
    alpha_c = v * rcp(v - iou + (1.0 + _EPS7))
    ciou = iou - (rho2 * rcp(c2) + v * alpha_c)
    overlaps = jnp.maximum(ciou, 0.0)                                  # (B,G,A)

    # ---- cost_distance ("lpf" improvement term) -> (B, G, A) -----------------
    gt_r = jnp.minimum(w1, h1) * rcp(jnp.maximum(w1, h1))              # (B,G,1)
    pd_r = jnp.minimum(w2, h2) * rcp(jnp.maximum(w2, h2))              # (B,1,A)
    cost_shape = 1.0 - jnp.abs(gt_r - pd_r) * rcp(jnp.maximum(gt_r, pd_r))
    norm_cs = cost_shape * rcp(jnp.max(cost_shape, axis=2, keepdims=True) + _EPS7)
    gt_area = w1 * h1
    pd_area = w2 * h2
    cost_area = 1.0 - jnp.abs(gt_area - pd_area) * rcp(jnp.maximum(gt_area, pd_area))
    norm_ca = cost_area * rcp(jnp.max(cost_area, axis=2, keepdims=True) + _EPS7)
    r1 = w1 * rcp(h1)
    r2 = w2 * rcp(h2)
    cost_wh = jnp.minimum(r1, r2) * rcp(jnp.maximum(r1, r2))
    norm_cw = cost_wh * rcp(jnp.max(cost_wh, axis=2, keepdims=True) + _EPS7)
    cost_impr = jnp.maximum((norm_cs + norm_cw + norm_ca) / 3.0, 0.0)   # (B,G,A)

    # ---- class-score gather via one-hot matmul (MXU) -> (B, G, A) ------------
    # leading-1 iota; broadcast supplies B (perf feedback).  kept f32 for parity
    # (bf16 one-hot + scores would hit the single-pass bf16 MXU on v6e if ~1e-3
    # score error is acceptable).
    c_iota_gc = lax.broadcasted_iota(jnp.int32, (1, 1, C), 2).astype(jnp.float32)
    onehot_gc = (c_iota_gc == labels_f).astype(jnp.float32)             # (B,G,C)
    bbox_scores = jnp.einsum('bgc,bca->bga', onehot_gc, scores,
                             preferred_element_type=jnp.float32)        # (B,G,A)

    # overlaps**6 via square-and-multiply (3 muls, depth 3)
    align_metric = _ipow(bbox_scores, alpha) * _ipow(overlaps, beta) * cost_impr

    # ---- anchors whose center lies inside the gt box -------------------------
    d = jnp.minimum(jnp.minimum(ax - gx1, ay - gy1),
                    jnp.minimum(gx2 - ax, gy2 - ay))
    mask_in_gts = (d > _EPS9).astype(jnp.float32)                       # (B,G,A)

    # ---- top-k anchors per gt -------------------------------------------------
    # Matches the reference: topk distinct anchors per gt (zero-metric ones
    # included when a gt has few positive candidates); invalid gts are zeroed
    # below via mgt (as topk_mask does in the reference).
    a_iota = lax.broadcasted_iota(jnp.int32, (1, 1, A), 2)              # (1,1,A)
    m0 = jnp.maximum(align_metric, 0.0) * mask_in_gts                   # >= 0
    n_iter = min(int(topk), A)

    if packed_topk:
        # ONE lane reduction per iteration: metric bits (order-preserving int32
        # bitcast of a non-negative f32) with the inverted anchor index folded
        # into the low ceil(log2(A)) bits -> jnp.max picks the highest metric
        # and, among (truncated-)ties, the lowest anchor index.  Keys are unique
        # per row, so the equality select hits exactly one anchor.
        nbits = max(int(A - 1).bit_length(), 1)
        keep_mask = jnp.int32(-(1 << nbits))                 # clears low nbits
        inv_idx = jnp.int32(A - 1) - a_iota                  # (1,1,A), < 2**nbits
        mbits = pltpu.bitcast(m0, jnp.int32)                 # monotone for m0>=0
        key0 = (mbits & keep_mask) | inv_idx                 # (B,G,A) >= 0
        knocked = jnp.int32(jnp.iinfo(jnp.int32).min)        # < every valid key

        def topk_body(_, carry):
            key, acc = carry
            cur = jnp.max(key, axis=2, keepdims=True)        # single XLU reduce
            sel = key == cur                                  # exactly one / row
            return jnp.where(sel, knocked, key), acc + sel.astype(jnp.float32)

        _, topk_acc = lax.fori_loop(0, n_iter, topk_body,
                                    (key0, jnp.zeros_like(m0)))
    else:
        # exact two-reduce variant (bit-exact first-index tie-break) for parity.
        neg_inf = jnp.float32(-jnp.inf)

        def topk_body(_, carry):
            m, acc = carry
            cur = jnp.max(m, axis=2, keepdims=True)
            cand = jnp.where(m == cur, a_iota, A)
            sel_i = jnp.min(cand, axis=2, keepdims=True)
            sel = a_iota == sel_i
            return jnp.where(sel, neg_inf, m), acc + sel.astype(jnp.float32)

        _, topk_acc = lax.fori_loop(0, n_iter, topk_body,
                                    (m0, jnp.zeros_like(m0)))

    mask_pos = topk_acc * mask_in_gts * mgt                             # (B,G,A)

    # ---- resolve anchors assigned to multiple gts (highest CIoU wins) --------
    fg = jnp.sum(mask_pos, axis=1, keepdims=True)                       # (B,1,A)
    g_col = lax.broadcasted_iota(jnp.int32, (1, G, 1), 1)               # (1,G,1)
    omax = jnp.max(overlaps, axis=1, keepdims=True)
    cand_g = jnp.where(overlaps == omax, g_col, G)
    amax_g = jnp.min(cand_g, axis=1, keepdims=True)
    is_max = (g_col == amax_g).astype(jnp.float32)
    mask_pos = jnp.where(fg > 1.0, is_max, mask_pos)   # no-op when no multi-assign
    fg = jnp.sum(mask_pos, axis=1, keepdims=True)                       # (B,1,A)

    # ---- target selection: mask_pos is one-hot wherever fg > 0, so no argmax;
    # background columns fall back to gt 0 (== torch argmax of an all-zero col).
    g0 = (g_col == 0).astype(jnp.float32)                               # (1,G,1)
    sel_gt = jnp.where(fg > 0.0, mask_pos, g0)                          # (B,G,A)

    # ---- gather targets: one MXU einsum over the tiny G axis, boxes + label ---
    tgt = jnp.einsum('bgf,bga->bfa', gpk[:, :, 0:5], sel_gt,
                     preferred_element_type=jnp.float32)                # (B,5,A)
    tb_ref[...] = tgt[:, 0:4, :]                                        # one store
    tlab_f = tgt[:, 4:5, :]                                             # (B,1,A)
    tl_ref[...] = tlab_f.astype(jnp.int32)

    # ---- score normalization + fused one-hot epilogue -------------------------
    am = align_metric * mask_pos
    pos_align = jnp.max(am, axis=2, keepdims=True)                      # (B,G,1)
    pos_ov = jnp.max(overlaps * mask_pos, axis=2, keepdims=True)        # (B,G,1)
    scale = pos_ov / (pos_align + eps)          # exact divide on tiny (B,G,1)
    norm_am = jnp.max(am * scale, axis=1, keepdims=True)                # (B,1,A)
    row = jnp.where(fg > 0.0, norm_am, 0.0)                             # (B,1,A)

    c_iota_c1 = lax.broadcasted_iota(jnp.int32, (1, C, 1), 1).astype(jnp.float32)
    ts_ref[...] = jnp.where(c_iota_c1 == tlab_f, row, 0.0)              # (B,C,A)
    fg_ref[...] = fg


def _tpu_kind():
    try:
        return jax.devices()[0].device_kind.lower()
    except Exception:
        return ""


class TaskAlignedAssignerPallas:
    def __init__(self, topk=13, num_classes=80, alpha=1.0, beta=6.0, eps=1e-9,
                 batch_block=4, use_approx_reciprocal=True, use_packed_topk=True,
                 vmem_limit_bytes=None):
        self.topk = topk
        self.num_classes = num_classes
        self.bg_idx = num_classes
        self.alpha = alpha
        self.beta = beta
        self.eps = eps
        self.batch_block = batch_block
        self.use_approx_reciprocal = use_approx_reciprocal
        self.use_packed_topk = use_packed_topk
        self.vmem_limit_bytes = vmem_limit_bytes

    def __call__(self, pd_scores, pd_bboxes, anc_points, gt_labels, gt_bboxes, mask_gt):
        bs, A, C = pd_scores.shape
        G = gt_bboxes.shape[1]
        if G == 0:
            return (jnp.full((bs, A), self.bg_idx, jnp.int32),
                    jnp.zeros_like(pd_bboxes),
                    jnp.zeros_like(pd_scores),
                    jnp.zeros((bs, A), jnp.bool_))

        pd_scores = pd_scores.astype(jnp.float32)
        pd_bboxes = pd_bboxes.astype(jnp.float32)
        gt_bboxes = gt_bboxes.astype(jnp.float32)
        anc_points = anc_points.astype(jnp.float32)

        # glue: per-box atan(w/h) (atan has no reliable Mosaic lowering) and the
        # layout-plumbing transposes that make the kernel anchors-on-lanes.
        gw = gt_bboxes[..., 2] - gt_bboxes[..., 0]
        gh = gt_bboxes[..., 3] - gt_bboxes[..., 1] + _EPS7
        pw = pd_bboxes[..., 2] - pd_bboxes[..., 0]
        ph = pd_bboxes[..., 3] - pd_bboxes[..., 1] + _EPS7
        atan_gt = jnp.arctan(gw / gh).reshape(bs, G, 1).astype(jnp.float32)
        atan_pd = jnp.arctan(pw / ph).reshape(bs, 1, A).astype(jnp.float32)

        # pack all tiny per-gt inputs into ONE (bs, G, 8) array -> one DMA/step.
        gpk = jnp.concatenate(
            [gt_bboxes,
             gt_labels.reshape(bs, G, 1).astype(jnp.float32),
             mask_gt.reshape(bs, G, 1).astype(jnp.float32),
             atan_gt,
             jnp.zeros((bs, G, 1), jnp.float32)], axis=-1)          # (bs, G, 8)

        scores_t = jnp.transpose(pd_scores, (0, 2, 1))       # (bs, C, A)
        pdb_t = jnp.transpose(pd_bboxes, (0, 2, 1))          # (bs, 4, A)
        anc_t = jnp.transpose(anc_points, (1, 0))            # (2, A)

        # batch block: several batch elements per grid step (amortize per-step
        # overhead); keep >= 2 grid steps so v7x megacore gets both cores busy,
        # and cap the block at 2 on v7x for its 64 MiB VMEM budget.
        kind = _tpu_kind()
        is_v7 = ("v7" in kind) or ("7x" in kind)
        blk_cap = self.batch_block
        if is_v7:
            blk_cap = min(blk_cap, 2)
        if bs >= 2:
            blk_cap = min(blk_cap, bs // 2)
        blk_cap = max(blk_cap, 1)
        bblk = 1
        for cand in range(min(bs, blk_cap), 0, -1):
            if bs % cand == 0:
                bblk = cand
                break
        nb = bs // bblk

        if self.vmem_limit_bytes is not None:
            vmem_limit = self.vmem_limit_bytes
        elif is_v7:
            vmem_limit = 48 * 1024 * 1024    # 64 MiB physical on v7x
        elif ("v5" in kind) or ("v6" in kind):
            vmem_limit = 96 * 1024 * 1024    # 128 MiB physical on v5e/v6e
        else:
            vmem_limit = 32 * 1024 * 1024    # conservative fallback

        # TODO(synk): for production anchor counts (A ~ 8400, C = 80) add an
        # anchor-tile grid axis ('arbitrary') with VMEM scratch accumulators for
        # the per-gt maxima and a streaming top-k state (two-pass scheme); at
        # these block sizes a single-A block fits comfortably in VMEM.

        kernel = functools.partial(
            _tal_kernel, topk=self.topk, alpha=self.alpha, beta=self.beta,
            eps=self.eps, approx_recip=self.use_approx_reciprocal,
            packed_topk=self.use_packed_topk)

        in_specs = [
            pl.BlockSpec((bblk, C, A), lambda b: (b, 0, 0)),   # pd_scores (C,A)
            pl.BlockSpec((bblk, 4, A), lambda b: (b, 0, 0)),   # pd_bboxes (4,A)
            pl.BlockSpec((2, A), lambda b: (0, 0)),            # anchors (shared)
            pl.BlockSpec((bblk, 1, A), lambda b: (b, 0, 0)),   # atan(w/h) pd
            pl.BlockSpec((bblk, G, 8), lambda b: (b, 0, 0)),   # packed gt info
        ]
        out_specs = [
            pl.BlockSpec((bblk, 1, A), lambda b: (b, 0, 0)),   # target_labels
            pl.BlockSpec((bblk, 4, A), lambda b: (b, 0, 0)),   # target_bboxes
            pl.BlockSpec((bblk, C, A), lambda b: (b, 0, 0)),   # target_scores
            pl.BlockSpec((bblk, 1, A), lambda b: (b, 0, 0)),   # fg counts
        ]
        out_shape = (
            jax.ShapeDtypeStruct((bs, 1, A), jnp.int32),
            jax.ShapeDtypeStruct((bs, 4, A), jnp.float32),
            jax.ShapeDtypeStruct((bs, C, A), jnp.float32),
            jax.ShapeDtypeStruct((bs, 1, A), jnp.float32),
        )

        tl, tb, ts, fg = pl.pallas_call(
            kernel,
            grid=(nb,),
            in_specs=in_specs,
            out_specs=out_specs,
            out_shape=out_shape,
            compiler_params=pltpu.CompilerParams(
                dimension_semantics=("parallel",),
                vmem_limit_bytes=vmem_limit),
        )(scores_t, pdb_t, anc_t, atan_pd, gpk)

        # cheap wrapper-side layout plumbing back to the reference output layout
        target_labels = tl[:, 0, :]                           # (bs, A) int32
        target_bboxes = jnp.transpose(tb, (0, 2, 1))          # (bs, A, 4)
        target_scores = jnp.transpose(ts, (0, 2, 1))          # (bs, A, C)
        fg_mask = fg[:, 0, :] > 0.0                           # (bs, A) bool
        return target_labels, target_bboxes, target_scores, fg_mask


def _rand_boxes(key, shape):
    k1, k2 = jax.random.split(key)
    cxy = jax.random.uniform(k1, shape + (2,), minval=4.0, maxval=28.0)
    wh = jax.random.uniform(k2, shape + (2,), minval=2.0, maxval=14.0)
    x1y1 = jnp.clip(cxy - wh / 2.0, 0.0, 32.0)
    x2y2 = jnp.clip(cxy + wh / 2.0, 0.0, 32.0)
    return jnp.concatenate([x1y1, x2y2], axis=-1).astype(jnp.float32)


if __name__ == "__main__":
    bs, A, C, G = 2, 64, 16, 8            # batch, anchors (8x8 grid), classes, max gts
    key = jax.random.PRNGKey(0)
    ks = jax.random.split(key, 5)

    # 8x8 anchor grid with stride 4 on a 32x32 "image"
    xs = (jnp.arange(8, dtype=jnp.float32) + 0.5) * 4.0
    gx, gy = jnp.meshgrid(xs, xs, indexing="xy")
    anc_points = jnp.stack([gx.reshape(-1), gy.reshape(-1)], axis=-1)   # (64, 2)

    pd_scores = jax.nn.sigmoid(jax.random.normal(ks[0], (bs, A, C), dtype=jnp.float32))
    pd_bboxes = _rand_boxes(ks[1], (bs, A))
    gt_bboxes = _rand_boxes(ks[2], (bs, G))
    gt_labels = jax.random.randint(ks[3], (bs, G, 1), 0, C).astype(jnp.int32)
    n_valid = jnp.array([6, 4])
    mask_gt = (jnp.arange(G)[None, :] < n_valid[:, None]).astype(jnp.float32)[..., None]

    assigner = TaskAlignedAssignerPallas(topk=13, num_classes=C)
    tl, tb, ts, fg = assigner(pd_scores, pd_bboxes, anc_points,
                              gt_labels, gt_bboxes, mask_gt)
    jax.block_until_ready((tl, tb, ts, fg))

    assert tl.shape == (bs, A) and tb.shape == (bs, A, 4)
    assert ts.shape == (bs, A, C) and fg.shape == (bs, A)
    assert bool(jnp.all(jnp.isfinite(tb))) and bool(jnp.all(jnp.isfinite(ts)))
    assert bool(jnp.all((tl >= 0) & (tl < C)))
    # target_scores may only be nonzero on foreground anchors
    ts_any = jnp.sum(ts, axis=-1) > 0.0
    assert bool(jnp.all(jnp.logical_or(~ts_any, fg)))
    print("KERNEL_OK")
</pallas_src>

<mosaic_0001>
module attributes {stable_mosaic.version = 11 : i64} {
  func.func @_tal_kernel(%arg0: i32, %arg1: memref<1x16x64xf32, #tpu.memory_space<vmem>>, %arg2: memref<1x4x64xf32, #tpu.memory_space<vmem>>, %arg3: memref<2x64xf32, #tpu.memory_space<vmem>>, %arg4: memref<1x1x64xf32, #tpu.memory_space<vmem>>, %arg5: memref<1x8x8xf32, #tpu.memory_space<vmem>>, %arg6: memref<1x1x64xi32, #tpu.memory_space<vmem>>, %arg7: memref<1x4x64xf32, #tpu.memory_space<vmem>>, %arg8: memref<1x16x64xf32, #tpu.memory_space<vmem>>, %arg9: memref<1x1x64xf32, #tpu.memory_space<vmem>>) attributes {dimension_semantics = [#tpu.dimension_semantics<parallel>], iteration_bounds = array<i64: 2>, scalar_prefetch = 0 : i64, scratch_operands = 0 : i64, tpu.core_type = #tpu.core_type<tc>, window_params = [{transform_indices = @transform_0, window_bounds = array<i64: 1, 16, 64>}, {transform_indices = @transform_1, window_bounds = array<i64: 1, 4, 64>}, {pipeline_mode = #tpu.pipeline_mode<synchronous>, transform_indices = @transform_2, window_bounds = array<i64: 2, 64>}, {transform_indices = @transform_3, window_bounds = array<i64: 1, 1, 64>}, {transform_indices = @transform_4, window_bounds = array<i64: 1, 8, 8>}, {transform_indices = @transform_5, window_bounds = array<i64: 1, 1, 64>}, {transform_indices = @transform_6, window_bounds = array<i64: 1, 4, 64>}, {transform_indices = @transform_7, window_bounds = array<i64: 1, 16, 64>}, {transform_indices = @transform_8, window_bounds = array<i64: 1, 1, 64>}]} {
    %c0 = arith.constant 0 : index
    %c0_0 = arith.constant 0 : index
    %c0_1 = arith.constant 0 : index
    %0 = vector.load %arg1[%c0, %c0_0, %c0_1] : memref<1x16x64xf32, #tpu.memory_space<vmem>>, vector<1x16x64xf32>
    %c0_2 = arith.constant 0 : index
    %c0_3 = arith.constant 0 : index
    %c0_4 = arith.constant 0 : index
    %1 = vector.load %arg2[%c0_2, %c0_3, %c0_4] : memref<1x4x64xf32, #tpu.memory_space<vmem>>, vector<1x4x64xf32>
    %c0_5 = arith.constant 0 : index
    %c0_6 = arith.constant 0 : index
    %2 = vector.load %arg3[%c0_5, %c0_6] : memref<2x64xf32, #tpu.memory_space<vmem>>, vector<2x64xf32>
    %c0_7 = arith.constant 0 : index
    %c0_8 = arith.constant 0 : index
    %c0_9 = arith.constant 0 : index
    %3 = vector.load %arg4[%c0_7, %c0_8, %c0_9] : memref<1x1x64xf32, #tpu.memory_space<vmem>>, vector<1x1x64xf32>
    %c0_10 = arith.constant 0 : index
    %c0_11 = arith.constant 0 : index
    %c0_12 = arith.constant 0 : index
    %4 = vector.load %arg5[%c0_10, %c0_11, %c0_12] : memref<1x8x8xf32, #tpu.memory_space<vmem>>, vector<1x8x8xf32>
    %5 = vector.extract_strided_slice %4 {offsets = [0, 0, 0], sizes = [1, 8, 4], strides = [1, 1, 1]} : vector<1x8x8xf32> to vector<1x8x4xf32>
    %6 = vector.extract_strided_slice %4 {offsets = [0, 0, 4], sizes = [1, 8, 1], strides = [1, 1, 1]} : vector<1x8x8xf32> to vector<1x8x1xf32>
    %7 = vector.extract_strided_slice %4 {offsets = [0, 0, 5], sizes = [1, 8, 1], strides = [1, 1, 1]} : vector<1x8x8xf32> to vector<1x8x1xf32>
    %8 = vector.extract_strided_slice %4 {offsets = [0, 0, 6], sizes = [1, 8, 1], strides = [1, 1, 1]} : vector<1x8x8xf32> to vector<1x8x1xf32>
    %9 = vector.extract_strided_slice %5 {offsets = [0, 0, 0], sizes = [1, 8, 1], strides = [1, 1, 1]} : vector<1x8x4xf32> to vector<1x8x1xf32>
    %10 = vector.extract_strided_slice %5 {offsets = [0, 0, 1], sizes = [1, 8, 1], strides = [1, 1, 1]} : vector<1x8x4xf32> to vector<1x8x1xf32>
    %11 = vector.extract_strided_slice %5 {offsets = [0, 0, 2], sizes = [1, 8, 1], strides = [1, 1, 1]} : vector<1x8x4xf32> to vector<1x8x1xf32>
    %12 = vector.extract_strided_slice %5 {offsets = [0, 0, 3], sizes = [1, 8, 1], strides = [1, 1, 1]} : vector<1x8x4xf32> to vector<1x8x1xf32>
    %13 = vector.extract_strided_slice %1 {offsets = [0, 0, 0], sizes = [1, 1, 64], strides = [1, 1, 1]} : vector<1x4x64xf32> to vector<1x1x64xf32>
    %14 = vector.extract_strided_slice %1 {offsets = [0, 1, 0], sizes = [1, 1, 64], strides = [1, 1, 1]} : vector<1x4x64xf32> to vector<1x1x64xf32>
    %15 = vector.extract_strided_slice %1 {offsets = [0, 2, 0], sizes = [1, 1, 64], strides = [1, 1, 1]} : vector<1x4x64xf32> to vector<1x1x64xf32>
    %16 = vector.extract_strided_slice %1 {offsets = [0, 3, 0], sizes = [1, 1, 64], strides = [1, 1, 1]} : vector<1x4x64xf32> to vector<1x1x64xf32>
    %17 = vector.extract_strided_slice %2 {offsets = [0, 0], sizes = [1, 64], strides = [1, 1]} : vector<2x64xf32> to vector<1x64xf32>
    %18 = vector.shape_cast %17 : vector<1x64xf32> to vector<1x1x64xf32>
    %19 = vector.extract_strided_slice %2 {offsets = [1, 0], sizes = [1, 64], strides = [1, 1]} : vector<2x64xf32> to vector<1x64xf32>
    %20 = vector.shape_cast %19 : vector<1x64xf32> to vector<1x1x64xf32>
    %21 = arith.subf %11, %9 : vector<1x8x1xf32>
    %22 = arith.subf %12, %10 : vector<1x8x1xf32>
    %cst = arith.constant 1.000000e-07 : f32
    %23 = vector.broadcast %cst : f32 to vector<1x8x1xf32>
    %24 = arith.addf %22, %23 : vector<1x8x1xf32>
    %25 = arith.subf %15, %13 : vector<1x1x64xf32>
    %26 = arith.subf %16, %14 : vector<1x1x64xf32>
    %cst_13 = arith.constant 1.000000e-07 : f32
    %27 = vector.broadcast %cst_13 : f32 to vector<1x1x64xf32>
    %28 = arith.addf %26, %27 : vector<1x1x64xf32>
    %29 = vector.broadcast %11 : vector<1x8x1xf32> to vector<1x8x64xf32>
    %30 = vector.broadcast %15 : vector<1x1x64xf32> to vector<1x8x64xf32>
    %31 = arith.minimumf %29, %30 : vector<1x8x64xf32>
    %32 = vector.broadcast %9 : vector<1x8x1xf32> to vector<1x8x64xf32>
    %33 = vector.broadcast %13 : vector<1x1x64xf32> to vector<1x8x64xf32>
    %34 = arith.maximumf %32, %33 : vector<1x8x64xf32>
    %35 = arith.subf %31, %34 : vector<1x8x64xf32>
    %cst_14 = arith.constant 0.000000e+00 : f32
    %36 = vector.broadcast %cst_14 : f32 to vector<1x8x64xf32>
    %37 = arith.maximumf %35, %36 : vector<1x8x64xf32>
    %38 = vector.broadcast %12 : vector<1x8x1xf32> to vector<1x8x64xf32>
    %39 = vector.broadcast %16 : vector<1x1x64xf32> to vector<1x8x64xf32>
    %40 = arith.minimumf %38, %39 : vector<1x8x64xf32>
    %41 = vector.broadcast %10 : vector<1x8x1xf32> to vector<1x8x64xf32>
    %42 = vector.broadcast %14 : vector<1x1x64xf32> to vector<1x8x64xf32>
    %43 = arith.maximumf %41, %42 : vector<1x8x64xf32>
    %44 = arith.subf %40, %43 : vector<1x8x64xf32>
    %cst_15 = arith.constant 0.000000e+00 : f32
    %45 = vector.broadcast %cst_15 : f32 to vector<1x8x64xf32>
    %46 = arith.maximumf %44, %45 : vector<1x8x64xf32>
    %47 = arith.mulf %37, %46 : vector<1x8x64xf32>
    %48 = arith.mulf %21, %24 : vector<1x8x1xf32>
    %49 = arith.mulf %25, %28 : vector<1x1x64xf32>
    %50 = vector.broadcast %48 : vector<1x8x1xf32> to vector<1x8x64xf32>
    %51 = vector.broadcast %49 : vector<1x1x64xf32> to vector<1x8x64xf32>
    %52 = arith.addf %50, %51 : vector<1x8x64xf32>
    %53 = arith.subf %52, %47 : vector<1x8x64xf32>
    %cst_16 = arith.constant 1.000000e-07 : f32
    %54 = vector.broadcast %cst_16 : f32 to vector<1x8x64xf32>
    %55 = arith.addf %53, %54 : vector<1x8x64xf32>
    %56 = tpu.reciprocal %55 {approx = true} : vector<1x8x64xf32> -> vector<1x8x64xf32>
    %57 = arith.mulf %47, %56 : vector<1x8x64xf32>
    %58 = vector.broadcast %11 : vector<1x8x1xf32> to vector<1x8x64xf32>
    %59 = vector.broadcast %15 : vector<1x1x64xf32> to vector<1x8x64xf32>
    %60 = arith.maximumf %58, %59 : vector<1x8x64xf32>
    %61 = vector.broadcast %9 : vector<1x8x1xf32> to vector<1x8x64xf32>
    %62 = vector.broadcast %13 : vector<1x1x64xf32> to vector<1x8x64xf32>
    %63 = arith.minimumf %61, %62 : vector<1x8x64xf32>
    %64 = arith.subf %60, %63 : vector<1x8x64xf32>
    %65 = vector.broadcast %12 : vector<1x8x1xf32> to vector<1x8x64xf32>
    %66 = vector.broadcast %16 : vector<1x1x64xf32> to vector<1x8x64xf32>
    %67 = arith.maximumf %65, %66 : vector<1x8x64xf32>
    %68 = vector.broadcast %10 : vector<1x8x1xf32> to vector<1x8x64xf32>
    %69 = vector.broadcast %14 : vector<1x1x64xf32> to vector<1x8x64xf32>
    %70 = arith.minimumf %68, %69 : vector<1x8x64xf32>
    %71 = arith.subf %67, %70 : vector<1x8x64xf32>
    %72 = arith.mulf %64, %64 : vector<1x8x64xf32>
    %73 = arith.mulf %71, %71 : vector<1x8x64xf32>
    %74 = arith.addf %72, %73 : vector<1x8x64xf32>
    %cst_17 = arith.constant 1.000000e-07 : f32
    %75 = vector.broadcast %cst_17 : f32 to vector<1x8x64xf32>
    %76 = arith.addf %74, %75 : vector<1x8x64xf32>
    %77 = arith.addf %13, %15 : vector<1x1x64xf32>
    %78 = vector.broadcast %77 : vector<1x1x64xf32> to vector<1x8x64xf32>
    %79 = vector.broadcast %9 : vector<1x8x1xf32> to vector<1x8x64xf32>
    %80 = arith.subf %78, %79 : vector<1x8x64xf32>
    %81 = vector.broadcast %11 : vector<1x8x1xf32> to vector<1x8x64xf32>
    %82 = arith.subf %80, %81 : vector<1x8x64xf32>
    %83 = arith.addf %14, %16 : vector<1x1x64xf32>
    %84 = vector.broadcast %83 : vector<1x1x64xf32> to vector<1x8x64xf32>
    %85 = vector.broadcast %10 : vector<1x8x1xf32> to vector<1x8x64xf32>
    %86 = arith.subf %84, %85 : vector<1x8x64xf32>
    %87 = vector.broadcast %12 : vector<1x8x1xf32> to vector<1x8x64xf32>
    %88 = arith.subf %86, %87 : vector<1x8x64xf32>
    %89 = arith.mulf %82, %82 : vector<1x8x64xf32>
    %90 = arith.mulf %88, %88 : vector<1x8x64xf32>
    %91 = arith.addf %89, %90 : vector<1x8x64xf32>
    %cst_18 = arith.constant 2.500000e-01 : f32
    %92 = vector.broadcast %cst_18 : f32 to vector<1x8x64xf32>
    %93 = arith.mulf %91, %92 : vector<1x8x64xf32>
    %94 = vector.broadcast %3 : vector<1x1x64xf32> to vector<1x8x64xf32>
    %95 = vector.broadcast %8 : vector<1x8x1xf32> to vector<1x8x64xf32>
    %96 = arith.subf %94, %95 : vector<1x8x64xf32>
    %97 = arith.mulf %96, %96 : vector<1x8x64xf32>
    %cst_19 = arith.constant 0.405284733 : f32
    %98 = vector.broadcast %cst_19 : f32 to vector<1x8x64xf32>
    %99 = arith.mulf %98, %97 : vector<1x8x64xf32>
    %100 = arith.subf %99, %57 : vector<1x8x64xf32>
    %cst_20 = arith.constant 1.00000012 : f32
    %101 = vector.broadcast %cst_20 : f32 to vector<1x8x64xf32>
    %102 = arith.addf %100, %101 : vector<1x8x64xf32>
    %103 = tpu.reciprocal %102 {approx = true} : vector<1x8x64xf32> -> vector<1x8x64xf32>
    %104 = arith.mulf %99, %103 : vector<1x8x64xf32>
    %105 = tpu.reciprocal %76 {approx = true} : vector<1x8x64xf32> -> vector<1x8x64xf32>
    %106 = arith.mulf %93, %105 : vector<1x8x64xf32>
    %107 = arith.mulf %99, %104 : vector<1x8x64xf32>
    %108 = arith.addf %106, %107 : vector<1x8x64xf32>
    %109 = arith.subf %57, %108 : vector<1x8x64xf32>
    %cst_21 = arith.constant 0.000000e+00 : f32
    %110 = vector.broadcast %cst_21 : f32 to vector<1x8x64xf32>
    %111 = arith.maximumf %109, %110 : vector<1x8x64xf32>
    %112 = arith.minimumf %21, %24 : vector<1x8x1xf32>
    %113 = arith.maximumf %21, %24 : vector<1x8x1xf32>
    %114 = tpu.reciprocal %113 {approx = true} : vector<1x8x1xf32> -> vector<1x8x1xf32>
    %115 = arith.mulf %112, %114 : vector<1x8x1xf32>
    %116 = arith.minimumf %25, %28 : vector<1x1x64xf32>
    %117 = arith.maximumf %25, %28 : vector<1x1x64xf32>
    %118 = tpu.reciprocal %117 {approx = true} : vector<1x1x64xf32> -> vector<1x1x64xf32>
    %119 = arith.mulf %116, %118 : vector<1x1x64xf32>
    %120 = vector.broadcast %115 : vector<1x8x1xf32> to vector<1x8x64xf32>
    %121 = vector.broadcast %119 : vector<1x1x64xf32> to vector<1x8x64xf32>
    %122 = arith.subf %120, %121 : vector<1x8x64xf32>
    %123 = math.absf %122 : vector<1x8x64xf32>
    %124 = vector.broadcast %115 : vector<1x8x1xf32> to vector<1x8x64xf32>
    %125 = vector.broadcast %119 : vector<1x1x64xf32> to vector<1x8x64xf32>
    %126 = arith.maximumf %124, %125 : vector<1x8x64xf32>
    %127 = tpu.reciprocal %126 {approx = true} : vector<1x8x64xf32> -> vector<1x8x64xf32>
    %128 = arith.mulf %123, %127 : vector<1x8x64xf32>
    %cst_22 = arith.constant 1.000000e+00 : f32
    %129 = vector.broadcast %cst_22 : f32 to vector<1x8x64xf32>
    %130 = arith.subf %129, %128 : vector<1x8x64xf32>
    %cst_23 = arith.constant dense<0xFF800000> : vector<1x8xf32>
    %131 = vector.multi_reduction <maximumf>, %130, %cst_23 [2] : vector<1x8x64xf32> to vector<1x8xf32>
    %132 = vector.shape_cast %131 : vector<1x8xf32> to vector<1x8x1xf32>
    %cst_24 = arith.constant 1.000000e-07 : f32
    %133 = vector.broadcast %cst_24 : f32 to vector<1x8x1xf32>
    %134 = arith.addf %132, %133 : vector<1x8x1xf32>
    %135 = tpu.reciprocal %134 {approx = true} : vector<1x8x1xf32> -> vector<1x8x1xf32>
    %136 = vector.broadcast %135 : vector<1x8x1xf32> to vector<1x8x64xf32>
    %137 = arith.mulf %130, %136 : vector<1x8x64xf32>
    %138 = arith.mulf %21, %24 : vector<1x8x1xf32>
    %139 = arith.mulf %25, %28 : vector<1x1x64xf32>
    %140 = vector.broadcast %138 : vector<1x8x1xf32> to vector<1x8x64xf32>
    %141 = vector.broadcast %139 : vector<1x1x64xf32> to vector<1x8x64xf32>
    %142 = arith.subf %140, %141 : vector<1x8x64xf32>
    %143 = math.absf %142 : vector<1x8x64xf32>
    %144 = vector.broadcast %138 : vector<1x8x1xf32> to vector<1x8x64xf32>
    %145 = vector.broadcast %139 : vector<1x1x64xf32> to vector<1x8x64xf32>
    %146 = arith.maximumf %144, %145 : vector<1x8x64xf32>
    %147 = tpu.reciprocal %146 {approx = true} : vector<1x8x64xf32> -> vector<1x8x64xf32>
    %148 = arith.mulf %143, %147 : vector<1x8x64xf32>
    %cst_25 = arith.constant 1.000000e+00 : f32
    %149 = vector.broadcast %cst_25 : f32 to vector<1x8x64xf32>
    %150 = arith.subf %149, %148 : vector<1x8x64xf32>
    %cst_26 = arith.constant dense<0xFF800000> : vector<1x8xf32>
    %151 = vector.multi_reduction <maximumf>, %150, %cst_26 [2] : vector<1x8x64xf32> to vector<1x8xf32>
    %152 = vector.shape_cast %151 : vector<1x8xf32> to vector<1x8x1xf32>
    %cst_27 = arith.constant 1.000000e-07 : f32
    %153 = vector.broadcast %cst_27 : f32 to vector<1x8x1xf32>
    %154 = arith.addf %152, %153 : vector<1x8x1xf32>
    %155 = tpu.reciprocal %154 {approx = true} : vector<1x8x1xf32> -> vector<1x8x1xf32>
    %156 = vector.broadcast %155 : vector<1x8x1xf32> to vector<1x8x64xf32>
    %157 = arith.mulf %150, %156 : vector<1x8x64xf32>
    %158 = tpu.reciprocal %24 {approx = true} : vector<1x8x1xf32> -> vector<1x8x1xf32>
    %159 = arith.mulf %21, %158 : vector<1x8x1xf32>
    %160 = tpu.reciprocal %28 {approx = true} : vector<1x1x64xf32> -> vector<1x1x64xf32>
    %161 = arith.mulf %25, %160 : vector<1x1x64xf32>
    %162 = vector.broadcast %159 : vector<1x8x1xf32> to vector<1x8x64xf32>
    %163 = vector.broadcast %161 : vector<1x1x64xf32> to vector<1x8x64xf32>
    %164 = arith.minimumf %162, %163 : vector<1x8x64xf32>
    %165 = vector.broadcast %159 : vector<1x8x1xf32> to vector<1x8x64xf32>
    %166 = vector.broadcast %161 : vector<1x1x64xf32> to vector<1x8x64xf32>
    %167 = arith.maximumf %165, %166 : vector<1x8x64xf32>
    %168 = tpu.reciprocal %167 {approx = true} : vector<1x8x64xf32> -> vector<1x8x64xf32>
    %169 = arith.mulf %164, %168 : vector<1x8x64xf32>
    %cst_28 = arith.constant dense<0xFF800000> : vector<1x8xf32>
    %170 = vector.multi_reduction <maximumf>, %169, %cst_28 [2] : vector<1x8x64xf32> to vector<1x8xf32>
    %171 = vector.shape_cast %170 : vector<1x8xf32> to vector<1x8x1xf32>
    %cst_29 = arith.constant 1.000000e-07 : f32
    %172 = vector.broadcast %cst_29 : f32 to vector<1x8x1xf32>
    %173 = arith.addf %171, %172 : vector<1x8x1xf32>
    %174 = tpu.reciprocal %173 {approx = true} : vector<1x8x1xf32> -> vector<1x8x1xf32>
    %175 = vector.broadcast %174 : vector<1x8x1xf32> to vector<1x8x64xf32>
    %176 = arith.mulf %169, %175 : vector<1x8x64xf32>
    %177 = arith.addf %137, %176 : vector<1x8x64xf32>
    %178 = arith.addf %177, %157 : vector<1x8x64xf32>
    %cst_30 = arith.constant 3.000000e+00 : f32
    %179 = vector.broadcast %cst_30 : f32 to vector<1x8x64xf32>
    %180 = arith.divf %178, %179 : vector<1x8x64xf32>
    %cst_31 = arith.constant 0.000000e+00 : f32
    %181 = vector.broadcast %cst_31 : f32 to vector<1x8x64xf32>
    %182 = arith.maximumf %180, %181 : vector<1x8x64xf32>
    %183 = tpu.iota {dimensions = array<i32: 2>} : vector<1x1x16xi32>
    %184 = arith.sitofp %183 : vector<1x1x16xi32> to vector<1x1x16xf32>
    %185 = vector.broadcast %184 : vector<1x1x16xf32> to vector<1x8x16xf32>
    %186 = vector.broadcast %6 : vector<1x8x1xf32> to vector<1x8x16xf32>
    %187 = arith.cmpf oeq, %185, %186 : vector<1x8x16xf32>
    %188 = arith.extui %187 : vector<1x8x16xi1> to vector<1x8x16xi32>
    %189 = arith.sitofp %188 : vector<1x8x16xi32> to vector<1x8x16xf32>
    "tpu.trace_start"() <{level = 10 : i32, message = "bgc,bca->bga"}> : () -> ()
    %cst_32 = arith.constant dense<0.000000e+00> : vector<1x8x64xf32>
    %190 = tpu.matmul %189, %0, %cst_32 {dimension_numbers = #tpu.dot_dimension_numbers<[2], [1], [1], [2], [0, 0, 0, 1, 1, 2], [0], [0]>} : vector<1x8x16xf32>, vector<1x16x64xf32>, vector<1x8x64xf32> -> vector<1x8x64xf32>
    "tpu.trace_stop"() : () -> ()
    %191 = arith.mulf %111, %111 : vector<1x8x64xf32>
    %192 = arith.mulf %191, %191 : vector<1x8x64xf32>
    %193 = arith.mulf %191, %192 : vector<1x8x64xf32>
    %194 = arith.mulf %190, %193 : vector<1x8x64xf32>
    %195 = arith.mulf %194, %182 : vector<1x8x64xf32>
    %196 = vector.broadcast %18 : vector<1x1x64xf32> to vector<1x8x64xf32>
    %197 = vector.broadcast %9 : vector<1x8x1xf32> to vector<1x8x64xf32>
    %198 = arith.subf %196, %197 : vector<1x8x64xf32>
    %199 = vector.broadcast %20 : vector<1x1x64xf32> to vector<1x8x64xf32>
    %200 = vector.broadcast %10 : vector<1x8x1xf32> to vector<1x8x64xf32>
    %201 = arith.subf %199, %200 : vector<1x8x64xf32>
    %202 = arith.minimumf %198, %201 : vector<1x8x64xf32>
    %203 = vector.broadcast %11 : vector<1x8x1xf32> to vector<1x8x64xf32>
    %204 = vector.broadcast %18 : vector<1x1x64xf32> to vector<1x8x64xf32>
    %205 = arith.subf %203, %204 : vector<1x8x64xf32>
    %206 = vector.broadcast %12 : vector<1x8x1xf32> to vector<1x8x64xf32>
    %207 = vector.broadcast %20 : vector<1x1x64xf32> to vector<1x8x64xf32>
    %208 = arith.subf %206, %207 : vector<1x8x64xf32>
    %209 = arith.minimumf %205, %208 : vector<1x8x64xf32>
    %210 = arith.minimumf %202, %209 : vector<1x8x64xf32>
    %cst_33 = arith.constant 9.99999971E-10 : f32
    %211 = vector.broadcast %cst_33 : f32 to vector<1x8x64xf32>
    %212 = arith.cmpf ogt, %210, %211 : vector<1x8x64xf32>
    %213 = arith.extui %212 : vector<1x8x64xi1> to vector<1x8x64xi32>
    %214 = arith.sitofp %213 : vector<1x8x64xi32> to vector<1x8x64xf32>
    %215 = tpu.iota {dimensions = array<i32: 2>} : vector<1x1x64xi32>
    %cst_34 = arith.constant 0.000000e+00 : f32
    %216 = vector.broadcast %cst_34 : f32 to vector<1x8x64xf32>
    %217 = arith.maximumf %195, %216 : vector<1x8x64xf32>
    %218 = arith.mulf %217, %214 : vector<1x8x64xf32>
    %c63_i32 = arith.constant 63 : i32
    %219 = vector.broadcast %c63_i32 : i32 to vector<1x1x64xi32>
    %220 = arith.subi %219, %215 : vector<1x1x64xi32>
    %221 = tpu.bitcast %218 : vector<1x8x64xf32> -> vector<1x8x64xi32>
    %c-64_i32 = arith.constant -64 : i32
    %222 = vector.broadcast %c-64_i32 : i32 to vector<1x8x64xi32>
    %223 = arith.andi %221, %222 : vector<1x8x64xi32>
    %224 = vector.broadcast %220 : vector<1x1x64xi32> to vector<1x8x64xi32>
    %225 = arith.ori %223, %224 : vector<1x8x64xi32>
    %cst_35 = arith.constant 0.000000e+00 : f32
    %226 = vector.broadcast %cst_35 : f32 to vector<1x8x64xf32>
    %c-2147483648_i32 = arith.constant -2147483648 : i32
    %c0_i32 = arith.constant 0 : i32
    %c13_i32 = arith.constant 13 : i32
    %227 = arith.addi %c0_i32, %c13_i32 : i32
    %c1_i32 = arith.constant 1 : i32
    %228:2 = scf.for %arg10 = %c0_i32 to %227 step %c1_i32 iter_args(%arg11 = %225, %arg12 = %226) -> (vector<1x8x64xi32>, vector<1x8x64xf32>)  : i32 {
      %cst_63 = arith.constant dense<-2147483648> : vector<1x8xi32>
      %303 = vector.multi_reduction <maxsi>, %arg11, %cst_63 [2] : vector<1x8x64xi32> to vector<1x8xi32>
      %304 = vector.shape_cast %303 : vector<1x8xi32> to vector<1x8x1xi32>
      %305 = vector.broadcast %304 : vector<1x8x1xi32> to vector<1x8x64xi32>
      %306 = arith.cmpi eq, %arg11, %305 : vector<1x8x64xi32>
      %307 = vector.broadcast %c-2147483648_i32 : i32 to vector<1x8x64xi32>
      %308 = arith.select %306, %307, %arg11 : vector<1x8x64xi1>, vector<1x8x64xi32>
      %309 = arith.extui %306 : vector<1x8x64xi1> to vector<1x8x64xi32>
      %310 = arith.sitofp %309 : vector<1x8x64xi32> to vector<1x8x64xf32>
      %311 = arith.addf %arg12, %310 : vector<1x8x64xf32>
      scf.yield %308, %311 : vector<1x8x64xi32>, vector<1x8x64xf32>
    }
    %229 = arith.mulf %228#1, %214 : vector<1x8x64xf32>
    %230 = vector.broadcast %7 : vector<1x8x1xf32> to vector<1x8x64xf32>
    %231 = arith.mulf %229, %230 : vector<1x8x64xf32>
    %cst_36 = arith.constant dense<0.000000e+00> : vector<1x64xf32>
    %232 = vector.multi_reduction <add>, %231, %cst_36 [1] : vector<1x8x64xf32> to vector<1x64xf32>
    %233 = vector.shape_cast %232 : vector<1x64xf32> to vector<1x1x64xf32>
    %234 = tpu.iota {dimensions = array<i32: 1>} : vector<1x8x1xi32>
    %cst_37 = arith.constant dense<0xFF800000> : vector<1x64xf32>
    %235 = vector.multi_reduction <maximumf>, %111, %cst_37 [1] : vector<1x8x64xf32> to vector<1x64xf32>
    %236 = vector.shape_cast %235 : vector<1x64xf32> to vector<1x1x64xf32>
    %237 = vector.broadcast %236 : vector<1x1x64xf32> to vector<1x8x64xf32>
    %238 = arith.cmpf oeq, %111, %237 : vector<1x8x64xf32>
    %c8_i32 = arith.constant 8 : i32
    %239 = vector.shape_cast %234 : vector<1x8x1xi32> to vector<1x8x1xi32>
    %240 = vector.broadcast %239 : vector<1x8x1xi32> to vector<1x8x64xi32>
    %241 = vector.broadcast %c8_i32 : i32 to vector<1x8x64xi32>
    %242 = arith.select %238, %240, %241 : vector<1x8x64xi1>, vector<1x8x64xi32>
    %cst_38 = arith.constant dense<2147483647> : vector<1x64xi32>
    %243 = vector.multi_reduction <minsi>, %242, %cst_38 [1] : vector<1x8x64xi32> to vector<1x64xi32>
    %244 = vector.shape_cast %243 : vector<1x64xi32> to vector<1x1x64xi32>
    %245 = vector.broadcast %234 : vector<1x8x1xi32> to vector<1x8x64xi32>
    %246 = vector.broadcast %244 : vector<1x1x64xi32> to vector<1x8x64xi32>
    %247 = arith.cmpi eq, %245, %246 : vector<1x8x64xi32>
    %248 = arith.extui %247 : vector<1x8x64xi1> to vector<1x8x64xi32>
    %249 = arith.sitofp %248 : vector<1x8x64xi32> to vector<1x8x64xf32>
    %cst_39 = arith.constant 1.000000e+00 : f32
    %250 = vector.broadcast %cst_39 : f32 to vector<1x1x64xf32>
    %251 = arith.cmpf ogt, %233, %250 : vector<1x1x64xf32>
    %252 = vector.shape_cast %251 : vector<1x1x64xi1> to vector<1x1x64xi1>
    %253 = vector.broadcast %252 : vector<1x1x64xi1> to vector<1x8x64xi1>
    %254 = arith.select %253, %249, %231 : vector<1x8x64xi1>, vector<1x8x64xf32>
    %cst_40 = arith.constant dense<0.000000e+00> : vector<1x64xf32>
    %255 = vector.multi_reduction <add>, %254, %cst_40 [1] : vector<1x8x64xf32> to vector<1x64xf32>
    %256 = vector.shape_cast %255 : vector<1x64xf32> to vector<1x1x64xf32>
    %c0_i32_41 = arith.constant 0 : i32
    %257 = vector.broadcast %c0_i32_41 : i32 to vector<1x8x1xi32>
    %258 = arith.cmpi eq, %234, %257 : vector<1x8x1xi32>
    %259 = arith.extui %258 : vector<1x8x1xi1> to vector<1x8x1xi32>
    %260 = arith.sitofp %259 : vector<1x8x1xi32> to vector<1x8x1xf32>
    %cst_42 = arith.constant 0.000000e+00 : f32
    %261 = vector.broadcast %cst_42 : f32 to vector<1x1x64xf32>
    %262 = arith.cmpf ogt, %256, %261 : vector<1x1x64xf32>
    %263 = vector.shape_cast %262 : vector<1x1x64xi1> to vector<1x1x64xi1>
    %264 = vector.broadcast %263 : vector<1x1x64xi1> to vector<1x8x64xi1>
    %265 = vector.shape_cast %260 : vector<1x8x1xf32> to vector<1x8x1xf32>
    %266 = vector.broadcast %265 : vector<1x8x1xf32> to vector<1x8x64xf32>
    %267 = arith.select %264, %254, %266 : vector<1x8x64xi1>, vector<1x8x64xf32>
    %268 = vector.extract_strided_slice %4 {offsets = [0, 0, 0], sizes = [1, 8, 5], strides = [1, 1, 1]} : vector<1x8x8xf32> to vector<1x8x5xf32>
    "tpu.trace_start"() <{level = 10 : i32, message = "bgf,bga->bfa"}> : () -> ()
    %cst_43 = arith.constant dense<0.000000e+00> : vector<1x5x64xf32>
    %269 = tpu.matmul %268, %267, %cst_43 {dimension_numbers = #tpu.dot_dimension_numbers<[1], [1], [2], [2], [0, 0, 0, 2, 1, 2], [0], [0]>} : vector<1x8x5xf32>, vector<1x8x64xf32>, vector<1x5x64xf32> -> vector<1x5x64xf32>
    "tpu.trace_stop"() : () -> ()
    %270 = vector.extract_strided_slice %269 {offsets = [0, 0, 0], sizes = [1, 4, 64], strides = [1, 1, 1]} : vector<1x5x64xf32> to vector<1x4x64xf32>
    %c0_44 = arith.constant 0 : index
    %c0_45 = arith.constant 0 : index
    %c0_46 = arith.constant 0 : index
    %271 = vector.load %arg7[%c0_44, %c0_45, %c0_46] : memref<1x4x64xf32, #tpu.memory_space<vmem>>, vector<1x4x64xf32>
    tpu.vector_store %arg7[%c0_44, %c0_45, %c0_46], %270 {strides = array<i32>} : memref<1x4x64xf32, #tpu.memory_space<vmem>>, vector<1x4x64xf32>,
    %272 = vector.extract_strided_slice %269 {offsets = [0, 4, 0], sizes = [1, 1, 64], strides = [1, 1, 1]} : vector<1x5x64xf32> to vector<1x1x64xf32>
    %273 = arith.fptosi %272 : vector<1x1x64xf32> to vector<1x1x64xi32>
    %c0_47 = arith.constant 0 : index
    %c0_48 = arith.constant 0 : index
    %c0_49 = arith.constant 0 : index
    %274 = vector.load %arg6[%c0_47, %c0_48, %c0_49] : memref<1x1x64xi32, #tpu.memory_space<vmem>>, vector<1x1x64xi32>
    tpu.vector_store %arg6[%c0_47, %c0_48, %c0_49], %273 {strides = array<i32>} : memref<1x1x64xi32, #tpu.memory_space<vmem>>, vector<1x1x64xi32>,
    %275 = arith.mulf %195, %254 : vector<1x8x64xf32>
    %cst_50 = arith.constant dense<0xFF800000> : vector<1x8xf32>
    %276 = vector.multi_reduction <maximumf>, %275, %cst_50 [2] : vector<1x8x64xf32> to vector<1x8xf32>
    %277 = vector.shape_cast %276 : vector<1x8xf32> to vector<1x8x1xf32>
    %278 = arith.mulf %111, %254 : vector<1x8x64xf32>
    %cst_51 = arith.constant dense<0xFF800000> : vector<1x8xf32>
    %279 = vector.multi_reduction <maximumf>, %278, %cst_51 [2] : vector<1x8x64xf32> to vector<1x8xf32>
    %280 = vector.shape_cast %279 : vector<1x8xf32> to vector<1x8x1xf32>
    %cst_52 = arith.constant 9.99999971E-10 : f32
    %281 = vector.broadcast %cst_52 : f32 to vector<1x8x1xf32>
    %282 = arith.addf %277, %281 : vector<1x8x1xf32>
    %283 = arith.divf %280, %282 : vector<1x8x1xf32>
    %284 = vector.broadcast %283 : vector<1x8x1xf32> to vector<1x8x64xf32>
    %285 = arith.mulf %275, %284 : vector<1x8x64xf32>
    %cst_53 = arith.constant dense<0xFF800000> : vector<1x64xf32>
    %286 = vector.multi_reduction <maximumf>, %285, %cst_53 [1] : vector<1x8x64xf32> to vector<1x64xf32>
    %287 = vector.shape_cast %286 : vector<1x64xf32> to vector<1x1x64xf32>
    %cst_54 = arith.constant 0.000000e+00 : f32
    %288 = vector.broadcast %cst_54 : f32 to vector<1x1x64xf32>
    %289 = arith.cmpf ogt, %256, %288 : vector<1x1x64xf32>
    %cst_55 = arith.constant 0.000000e+00 : f32
    %290 = vector.broadcast %cst_55 : f32 to vector<1x1x64xf32>
    %291 = arith.select %289, %287, %290 : vector<1x1x64xi1>, vector<1x1x64xf32>
    %292 = tpu.iota {dimensions = array<i32: 1>} : vector<1x16x1xi32>
    %293 = arith.sitofp %292 : vector<1x16x1xi32> to vector<1x16x1xf32>
    %294 = vector.broadcast %293 : vector<1x16x1xf32> to vector<1x16x64xf32>
    %295 = vector.broadcast %272 : vector<1x1x64xf32> to vector<1x16x64xf32>
    %296 = arith.cmpf oeq, %294, %295 : vector<1x16x64xf32>
    %cst_56 = arith.constant 0.000000e+00 : f32
    %297 = vector.shape_cast %291 : vector<1x1x64xf32> to vector<1x1x64xf32>
    %298 = vector.broadcast %297 : vector<1x1x64xf32> to vector<1x16x64xf32>
    %299 = vector.broadcast %cst_56 : f32 to vector<1x16x64xf32>
    %300 = arith.select %296, %298, %299 : vector<1x16x64xi1>, vector<1x16x64xf32>
    %c0_57 = arith.constant 0 : index
    %c0_58 = arith.constant 0 : index
    %c0_59 = arith.constant 0 : index
    %301 = vector.load %arg8[%c0_57, %c0_58, %c0_59] : memref<1x16x64xf32, #tpu.memory_space<vmem>>, vector<1x16x64xf32>
    tpu.vector_store %arg8[%c0_57, %c0_58, %c0_59], %300 {strides = array<i32>} : memref<1x16x64xf32, #tpu.memory_space<vmem>>, vector<1x16x64xf32>,
    %c0_60 = arith.constant 0 : index
    %c0_61 = arith.constant 0 : index
    %c0_62 = arith.constant 0 : index
    %302 = vector.load %arg9[%c0_60, %c0_61, %c0_62] : memref<1x1x64xf32, #tpu.memory_space<vmem>>, vector<1x1x64xf32>
    tpu.vector_store %arg9[%c0_60, %c0_61, %c0_62], %256 {strides = array<i32>} : memref<1x1x64xf32, #tpu.memory_space<vmem>>, vector<1x1x64xf32>,
    return
  }
  func.func @transform_0(%arg0: i32) -> (i32, i32, i32) {
    %c0_i32 = arith.constant 0 : i32
    %c0_i32_0 = arith.constant 0 : i32
    %c0_i32_1 = arith.constant 0 : i32
    return %arg0, %c0_i32, %c0_i32_0 : i32, i32, i32
  }
  func.func @transform_1(%arg0: i32) -> (i32, i32, i32) {
    %c0_i32 = arith.constant 0 : i32
    %c0_i32_0 = arith.constant 0 : i32
    %c0_i32_1 = arith.constant 0 : i32
    return %arg0, %c0_i32, %c0_i32_0 : i32, i32, i32
  }
  func.func @transform_2(%arg0: i32) -> (i32, i32) {
    %c0_i32 = arith.constant 0 : i32
    %c0_i32_0 = arith.constant 0 : i32
    %c0_i32_1 = arith.constant 0 : i32
    return %c0_i32, %c0_i32_0 : i32, i32
  }
  func.func @transform_3(%arg0: i32) -> (i32, i32, i32) {
    %c0_i32 = arith.constant 0 : i32
    %c0_i32_0 = arith.constant 0 : i32
    %c0_i32_1 = arith.constant 0 : i32
    return %arg0, %c0_i32, %c0_i32_0 : i32, i32, i32
  }
  func.func @transform_4(%arg0: i32) -> (i32, i32, i32) {
    %c0_i32 = arith.constant 0 : i32
    %c0_i32_0 = arith.constant 0 : i32
    %c0_i32_1 = arith.constant 0 : i32
    return %arg0, %c0_i32, %c0_i32_0 : i32, i32, i32
  }
  func.func @transform_5(%arg0: i32) -> (i32, i32, i32) {
    %c0_i32 = arith.constant 0 : i32
    %c0_i32_0 = arith.constant 0 : i32
    %c0_i32_1 = arith.constant 0 : i32
    return %arg0, %c0_i32, %c0_i32_0 : i32, i32, i32
  }
  func.func @transform_6(%arg0: i32) -> (i32, i32, i32) {
    %c0_i32 = arith.constant 0 : i32
    %c0_i32_0 = arith.constant 0 : i32
    %c0_i32_1 = arith.constant 0 : i32
    return %arg0, %c0_i32, %c0_i32_0 : i32, i32, i32
  }
  func.func @transform_7(%arg0: i32) -> (i32, i32, i32) {
    %c0_i32 = arith.constant 0 : i32
    %c0_i32_0 = arith.constant 0 : i32
    %c0_i32_1 = arith.constant 0 : i32
    return %arg0, %c0_i32, %c0_i32_0 : i32, i32, i32
  }
  func.func @transform_8(%arg0: i32) -> (i32, i32, i32) {
    %c0_i32 = arith.constant 0 : i32
    %c0_i32_0 = arith.constant 0 : i32
    %c0_i32_1 = arith.constant 0 : i32
    return %arg0, %c0_i32, %c0_i32_0 : i32, i32, i32
  }
}

</mosaic_0001>

<bundles_post_ra>
// kernel: tpu_custom_call.1
= control target key start
LH: loop header
LB: loop body
LE: loop exit
PB: predicated region body
PF: predicated region fallthrough
CT: control target
= control target key end

     0   :  { %s2208_s0 = inlined_call_operand.hbm [shape: f32[2,16,64], index: 0, kind: input, shape index: {}]   ;;  %s2209_s1 = inlined_call_operand.hbm [shape: f32[2,4,64], index: 1, kind: input, shape index: {}]   ;;  %s2210_s2 = inlined_call_operand.hbm [shape: f32[2,64], index: 2, kind: input, shape index: {}]   ;;  %s2211_s3 = inlined_call_operand.vmem [shape: f32[2,1,64], index: 3, kind: input, shape index: {}]   ;;  %s2212_s4 = inlined_call_operand.hbm [shape: f32[2,8,8], index: 4, kind: input, shape index: {}]   ;;  %s2213_s5 = inlined_call_operand.hbm [shape: s32[2,1,64], index: 5, kind: output, shape index: {0}]   ;;  %s2214_s6 = inlined_call_operand.hbm [shape: f32[2,4,64], index: 6, kind: output, shape index: {1}]   ;;  %s2215_s7 = inlined_call_operand.hbm [shape: f32[2,16,64], index: 7, kind: output, shape index: {2}]   ;;  %s2216_s8 = inlined_call_operand.hbm [shape: f32[2,1,64], index: 8, kind: output, shape index: {3}]  }
   0x1   :  { %2225 = sst [smem:[#allocation28_spill]] %s2208_s0 }
   0x2   :  { %2226 = sst [smem:[#allocation29_spill]] %s2210_s2 }
   0x3   :  { %2227 = sst [smem:[#allocation30_spill]] %s2213_s5 }
   0x4   :  { %2228 = sst [smem:[#allocation31_spill]] %s2215_s7 }
   0x5   :  { %14 = vsyncpa [#allocation3], 0 }
   0x6   :  { %16 = vsyncpa [#allocation3 + $0x1], 0 }
   0x7   :  { %17 = vsyncpa [#allocation6], 0 }
   0x8   :  { %19 = vsyncpa [#allocation6 + $0x1], 0 }
   0x9   :  { %20 = vsyncpa [#allocation9], 0 }
   0xa   :  { %22 = vsyncpa [#allocation9 + $0x1], 0 }
   0xb   :  { %23 = vsyncpa [#allocation4], 0 }
   0xc   :  { %25 = vsyncpa [#allocation4 + $0x1], 0 }
   0xd   :  { %26 = vsyncpa [#allocation12], 0 }
   0xe   :  { %28 = vsyncpa [#allocation12 + $0x1], 0 }
   0xf   :  { %29 = vsyncpa [#allocation15], 0 }
  0x10   :  { %31 = vsyncpa [#allocation15 + $0x1], 0  ;;  %s1772_s27 = smov 0   ;;  %s1774_s28 = smov 0  }
  0x11   :  { %s1776_s29 = smov 0   ;;  %s1778_s30 = smov 0  }
  0x12 LB: > { %2229 = sst [smem:[#allocation23_spill]] %s1684_s27  ;;  %s1793_s9 = sadd.s32 4294967295, %s1696_s30   ;;  %s1696_s30 = sphi %s1778_s30, %s2248_s30   ;;  %s1692_s29 = sphi %s1776_s29, %s2250_s29   ;;  %s1688_s28 = sphi %s1774_s28, %s2252_s28   ;;  %s1684_s27 = sphi %s1772_s27, %s2251_s27  }
  0x13   : > { %2230 = sst [smem:[#allocation24_spill]] %s1692_s29  ;;  %s2217_s10 = sadd.s32 4294967294, %s1696_s30  }
  0x14   : > { %s1797_s11 = sadd.s32 1, %s1696_s30   ;;  %s44_s12 = sadd.s32 1, %s1692_s29 }
  0x15   : > { %2231 = sst [smem:[#allocation25_spill]] %s1797_s11  ;;  %s41_s13 = ssub.s32 %s1696_s30, %s1797_s11 }
  0x16   : > { %p51_p0 = scmp.ne.s32.totalorder %s1692_s29, %s1688_s28  ;;  %p42_p1 = scmp.eq.s32.totalorder %s41_s13, 0 }
  0x17   : > { %p52_p2 = scmp.eq.s32.totalorder %s1696_s30, 0  ;;  %p57_p3 = scmp.ne.s32.totalorder %s1688_s28, %s1684_s27 }
  0x18   : > { %p58_p4 = scmp.eq.s32.totalorder %s1793_s9, 0  ;;  %p180_p7 = scmp.eq.s32.totalorder %s1793_s9, 1 }
  0x19   : > { %s1809_s14 = scalar_select %p42_p1, %s1692_s29, %s44_s12  }
  0x1a   : > { %p1811_p5 = por %p52_p2, %p51_p0  ;;  %p1817_p6 = por %p58_p4, %p57_p3 }
  0x1b   : > { %2232 = sst [smem:[#allocation26_spill]] %s1809_s14  ;;  %p186_p8 = scmp.eq.s32.totalorder %s2217_s10, 1 }
  0x1c   : > { %p1194_p9 = scmp.ge.s32.totalorder %s1696_s30, 1  ;;  %p271_p10 = scmp.lt.s32.totalorder %s1696_s30, 3 }
  0x1d   : > { %p1826_p11 = por %p180_p7, %p51_p0  ;;  %p1830_p12 = por %p186_p8, %p57_p3 }
  0x1e   : > { %p1834_p13 = pnand %p1194_p9, %p271_p10  ;;  %s2239_s2 = sld [smem:[#allocation29_spill]] }
  0x1f   : > { %s2236_s18 = scalar_select %p1830_p12, 1, 0 }
  0x20   : > { %p1250_p1 = pneg %p1834_p13  ;;  %s1710_s23 = smov [#allocation7]  }
  0x21   : > { %2237 = sst [smem:[#allocation27_spill]] %s2236_s18  ;;  %s285_s24 = sshll.u32 %s1710_s23, 4  ;;  %s286_s24 = int_to_ptr.vmem [resolvable:$true] %s285_s24 }
  0x22   : > { %p1251_p2 = pnand %p1250_p1, %p58_p4  ;;  %p1278_p3 = scmp.lt.s32.totalorder %s1696_s30, 2 }
  0x23   : > { %s1848_s25 = sand.u32 1, %s1692_s29   ;;  %s1225_s13 = sshll.u32 %s1696_s30, 4 }
  0x24   : > { %s283_s22 = sshll.u32 %s2239_s2, 4  ;;  %p1852_p7 = pnand %p1278_p3, %p1811_p5  ;;  %s284_s22 = int_to_ptr.hbm [resolvable:$true] %s283_s22 }
  0x25   : > { %1253 = dma.hbm_to_vmem [thread:$0]  (!%p1251_p2), %s284_s22, 32, %s286_s24, [#allocation6]  }
  0x26   : > { %s1197_s12 = sshll.u32 %s1848_s25, 4  ;;  %s2241_s0 = sld [smem:[#allocation28_spill]] }
  0x27   : > { %s300_s2 = scalar_lea.vmem [#allocation2], %s1197_s12  ;;  %s297_s29 = scalar_lea.sflag [#allocation3], %s1848_s25 }
  0x28   : > { %s308_s14 = sshll.u32 %s300_s2, 4  ;;  %p1428_p8 = pneg %p1852_p7  ;;  %s309_s14 = int_to_ptr.vmem [resolvable:$true] %s308_s14 }
  0x2c   : > { %s305_s23 = scalar_lea.hbm %s2241_s0, %s1225_s13  ;;  %s1431_s13 = scalar_lea.hbm %s2241_s0, 32 }
  0x2d   : > { %s306_s10 = sshll.u32 %s305_s23, 4  ;;  %s307_s10 = int_to_ptr.hbm [resolvable:$true] %s306_s10 }
  0x2e   : > { %s1424_s22 = sshra.s32 %s307_s10, 4  ;;  %s1425_s22 = int_to_ptr.hbm [resolvable:$true] %s1424_s22 }
  0x2f   : > { %s1426_s15 = scalar_lea.hbm %s1425_s22, 16  ;;  %p1432_p1 = scmp.lt.s32.totalorder %s1425_s22, %s2241_s0 }
  0x30   : > { %p1427_p5 = scmp.ne.s32.totalorder %s1425_s22, %s1426_s15  ;;  %p1433_p2 = scmp.lt.s32.totalorder %s1431_s13, %s1426_s15 }
  0x32   : > { %p1429_p9 = pnand %p1428_p8, %p1427_p5  ;;  %p1434_p3 = por %p1433_p2, %p1432_p1 }
  0x34   : > { %p1430_p10 = pneg %p1429_p9 }
  0x36   : > { %p1435_p0 = pnand %p1434_p3, %p1430_p10 }
  0x38   : > { %1438 = shalt.err (!%p1435_p0)
}
  0x39   : > { %s1711_s2 = smov 128   ;;  %s1712_s21 = smov 8  }
  0x3a   : > { %1257 = dma.hbm_to_vmem [thread:$0]  (!%p1852_p7), %s307_s10, 256, %s309_s14, %s297_s29, %s1711_s2, %s1711_s2, %s1712_s21  }
  0x3b   : > { %s318_s11 = sand.u32 1, %s1696_s30   ;;  %s1200_s23 = sshll.u32 %s1848_s25, 2 }
  0x3c   : > { %s1201_s24 = sshll.u32 %s1696_s30, 2  ;;  %s322_s18 = scalar_lea.vmem [#allocation5], %s1200_s23 }
  0x3d   : > { %s330_s20 = sshll.u32 %s322_s18, 4  ;;  %s326_s13 = scalar_lea.hbm %s2209_s1, %s1201_s24  ;;  %s331_s20 = int_to_ptr.vmem [resolvable:$true] %s330_s20 }
  0x3e   : > { %s328_s12 = sshll.u32 %s326_s13, 4  ;;  %s1202_s0 = sshll.u32 %s1848_s25, 3  ;;  %s329_s12 = int_to_ptr.hbm [resolvable:$true] %s328_s12 }
  0x3f   : > { %s319_s27 = scalar_lea.sflag [#allocation6], %s318_s11  ;;  %s1454_s7 = sshra.s32 %s329_s12, 4  ;;  %s1455_s7 = int_to_ptr.hbm [resolvable:$true] %s1454_s7 }
  0x40   : > { %s1456_s5 = scalar_lea.hbm %s1455_s7, 4  ;;  %s1461_s14 = scalar_lea.hbm %s2209_s1, 8 }
  0x41   : > { %p1457_p0 = scmp.ne.s32.totalorder %s1455_s7, %s1456_s5  ;;  %p1462_p10 = scmp.lt.s32.totalorder %s1455_s7, %s2209_s1 }
  0x42   : > { %p1463_p1 = scmp.lt.s32.totalorder %s1461_s14, %s1456_s5 }
  0x43   : > { %p1459_p5 = pnand %p1457_p0, %p1428_p8 }
  0x44   : > { %p1464_p2 = por %p1463_p1, %p1462_p10 }
  0x45   : > { %p1460_p9 = pneg %p1459_p5 }
  0x47   : > { %p1465_p3 = pnand %p1464_p2, %p1460_p9 }
  0x49   : > { %1468 = shalt.err (!%p1465_p3)
}
  0x4a   : > { %1260 = dma.hbm_to_vmem [thread:$0]  (!%p1852_p7), %s329_s12, 64, %s331_s20, %s319_s27  }
  0x4b   : > { %s1203_s21 = sshll.u32 %s1696_s30, 3  ;;  %s347_s22 = scalar_lea.vmem [#allocation8], %s1202_s0 }
  0x4c   : > { %s351_s24 = scalar_lea.hbm %s2212_s4, %s1203_s21  ;;  %s355_s15 = sshll.u32 %s347_s22, 4  ;;  %s356_s15 = int_to_ptr.vmem [resolvable:$true] %s355_s15 }
  0x4d   : > { %s353_s13 = sshll.u32 %s351_s24, 4  ;;  %s344_s5 = scalar_lea.sflag [#allocation9], %s1848_s25  ;;  %s354_s13 = int_to_ptr.hbm [resolvable:$true] %s353_s13 }
  0x4e   : > { %s1484_s7 = sshra.s32 %s354_s13, 4  ;;  %s1491_s12 = scalar_lea.hbm %s2212_s4, 16  ;;  %s1485_s7 = int_to_ptr.hbm [resolvable:$true] %s1484_s7 }
  0x4f   : > { %s1486_s29 = scalar_lea.hbm %s1485_s7, 8  ;;  %p1492_p10 = scmp.lt.s32.totalorder %s1485_s7, %s2212_s4 }
  0x50   : > { %p1487_p0 = scmp.ne.s32.totalorder %s1485_s7, %s1486_s29  ;;  %p1493_p1 = scmp.lt.s32.totalorder %s1491_s12, %s1486_s29 }
  0x52   : > { %p1489_p5 = pnand %p1487_p0, %p1428_p8  ;;  %p1494_p2 = por %p1493_p1, %p1492_p10 }
  0x54   : > { %p1490_p9 = pneg %p1489_p5 }
  0x56   : > { %p1495_p3 = pnand %p1494_p2, %p1490_p9 }
  0x58   : > { %1498 = shalt.err (!%p1495_p3)
}
  0x59   : > { %1263 = dma.hbm_to_vmem [thread:$0]  (!%p1852_p7), %s354_s13, 128, %s356_s15, %s344_s5  }
  0x5a   : > { %364 = sbr.rel (%p1834_p13) target bundleno = 1118 (0x45e), region = 40  ;;  %s1912_s0 = sand.u32 (!%p1834_p13), 1, %s1688_s28  }
  0x5b   : > { %s1205_s25 = sshll.u32 (!%p1834_p13), %s1912_s0, 4  ;;  %s367_s18 = scalar_lea.sflag (!%p1834_p13), [#allocation3], %s1912_s0 }
  0x5c   : > { %s1918_s2 = scalar_lea.vmem (!%p1834_p13), [#allocation2], %s1205_s25 }
  0x5f   : > { %1655 = dma.done.wait (%p1817_p6), %s367_s18, 256  }
  0x60   : > { %1657 = vsyncadd (%p1817_p6), %s367_s18, 4294967040  ;;  %s376_s19 = sand.u32 1, %s1793_s9   ;;  %s1206_s26 = sshll.u32 %s1912_s0, 2 }
  0x61   : > { %s377_s21 = scalar_lea.sflag [#allocation6], %s376_s19  ;;  %s1930_s11 = scalar_lea.vmem [#allocation5], %s1206_s26 }
  0x62   : > { %1659 = dma.done.wait (%p1817_p6), %s377_s21, 64  }
  0x63   : > { %1661 = vsyncadd (%p1817_p6), %s377_s21, 4294967232 }
  0x64   : > { %1663 = dma.done.wait (%p58_p4), [#allocation6], 32  }
  0x65   : > { %1665 = vsyncadd (%p58_p4), [#allocation6], 4294967264  ;;  %s1208_s23 = sshll.u32 %s1912_s0, 3  ;;  %s392_s24 = scalar_lea.sflag [#allocation9], %s1912_s0 }
  0x66   : > { %s395_s22 = scalar_lea.vmem [#allocation8], %s1208_s23 }
  0x67   : > { %1667 = dma.done.wait (%p1817_p6), %s392_s24, 128  }
  0x68   : > { %1669 = vsyncadd (%p1817_p6), %s392_s24, 4294967168  ;;  %v1946_v0 = vld [vmem:[%s395_s22] sm:$0xff]  ;;  %s1713_s15 = smov 2   ;;  %v1714_v1 = vmov 4   ;;  %s1715_s13 = smov 127   ;;  %v1716_v6 = vmov 0   ;;  %v644_v10 = vlaneseq }
  0x69   : > { %465 = vrot.lane.b32.xlu0 %v1946_v0, %s1713_s15  ;;  %v1717_v7 = vmov 2   ;;  %v459_v11 = vld [vmem:[%s1918_s2 + $0x8] sm:$0xff]  ;;  %v458_v12 = vld [vmem:[%s1918_s2] sm:$0xff]  ;;  %vm654_vm0 = vcmask 130048   ;;  %v1718_v21 = vmov 0.0   ;;  %p455_p4 = scmp.lt.s32.totalorder %s1793_s9, 1 }
  0x6a   : > { %1354 = vset.pattern.permute.xlu0 %v1714_v1  ;;  %1356 = vset.pattern.permute.xlu1 %v1717_v7  ;;  %v1955_v13 = vand.u32 127, %v644_v10  ;;  %v1719_v24 = vmov 3   ;;  %v1720_v25 = vmov 6   ;;  %v1721_v26 = vmov 1   ;;  %v1972_v27 = vld [vmem:[%s1930_s11] sm:$0xf] }
  0x6b   : > { %1355 = vset.pattern.permute.xlu2 %v1717_v7  ;;  %672 = vmatpush.msra.mxu0 %v459_v11  ;;  %s1961_s16 = scalar_select %p455_p4, %s1793_s9, 1  ;;  %v471_v28 = vrot.slane %v1972_v27, 6  ;;  %vm587_vm2 = vcmask 523264   ;;  %v485_v63 = vperm.slane %v1972_v27, 0 }
  0x6c   : > { %v646_v19 = vcvt.s32.f32 %v1955_v13  ;;  %s434_s12 = scalar_lea.vmem [#allocation10], %s1912_s0  ;;  %s2047_s10 = scalar_lea.vmem [#allocation11], %s1206_s26 }
  0x6d   : > { %673 = vmatpush.msra.mxu0 %v458_v12  ;;  %s457_s29 = scalar_lea.vmem %s2211_s3, %s1961_s16  ;;  %v473_v29 = vsub.f32 %v1972_v27, %v471_v28  ;;  %s2051_s14 = scalar_lea.vmem [#allocation13], %s1205_s25 }
  0x6e   : > { %s454_s18 = scalar_lea.vmem [#allocation14], %s1912_s0  ;;  %s2054_s2 = smov 0  }
  0x6f   : > { %v474_v30 = vadd.f32 1e-07, %v473_v29 }
  0x71   : > { %648 = vperm.xlu0 %1354, %v1946_v0   ;;  %v510_v31 = vrot.slane %v474_v30, 1 }
  0x73   : > { %v572_v32 = vmax.f32 %v473_v29, %v510_v31  ;;  %v571_v33 = vmin.f32 %v473_v29, %v510_v31  ;;  %v512_v39 = vmul.f32 %v510_v31, %v473_v29 }
  0x75   : > { %v518_v41 = vperm.slane %v512_v39, 2 }
  0x79   : > { %1357 = vset.pattern.permute.xlu0 %v1716_v6  ;;  %v493_v6 = vperm.slane %v1972_v27, 3 }
  0x7a   : > { %482 = vperm.xlu0 %1357, %v1946_v0  }
  0x82   : > { %1361 = vset.pattern.permute.xlu0 %v1714_v1  ;;  %v479_v1 = vperm.slane %v1972_v27, 2 }
  0xdb   : > { %v466_v2 = vpop.permute.xlu0 %465 }
  0xdc   : > { %v468_v3 = vsub.f32 %v1946_v0, %v466_v2  ;;  %v499_v2 = vperm.slane %v1972_v27, 1 }
  0xde   : > { %v469_v4 = vadd.f32 1e-07, %v468_v3 }
  0xe0   : > { %505 = vrot.lane.b32.xlu1 %v469_v4, %s1715_s13  ;;  %1363 = vrcp.f32 %v469_v4 }
  0xe3   : > { %v649_v16 = vpop.permute.xlu0 %648 }
  0xe4   : > { %vm651_vm1 = vcmp.eq.f32.partialorder %v646_v19, %v649_v16 }
  0xe5   : > { %v1211_v22 = vsel %vm651_vm1, 1.0, %v1718_v21 }
  0xe6   : > { %v1364_v5 = vpop.eup %1363  ;;  %1212 = vmatmul.msk.f32.vlgmr.msra.gmra.mxu0 %vm654_vm0, %v1211_v22 }
  0xe8   : > { %608 = vrot.lane.b32.xlu1 %v1364_v5, %s1715_s13 }
 0x152   : > { %v506_v8 = vpop.permute.xlu1 %505 }
 0x153   : > { %v568_v9 = vmax.f32 %v468_v3, %v506_v8  ;;  %v567_v15 = vmin.f32 %v468_v3, %v506_v8  ;;  %v508_v23 = vmul.f32 %v506_v8, %v468_v3 }
 0x155   : > { %1365 = vrcp.f32 %v568_v9 }
 0x156   : > { %1367 = vrcp.f32 %v572_v32 }
 0x157   : > { %1369 = vrcp.f32 %v474_v30 }
 0x15a   : > { %v609_v14 = vpop.permute.xlu1 %608 }
 0x15b   : > { %v1366_v17 = vpop.eup %1365  ;;  %v611_v18 = vmul.f32 %v609_v14, %v468_v3  ;;  %v1993_v3 = vpop.permute.xlu0 %482 }
 0x15c   : > { %v570_v20 = vmul.f32 %v1366_v17, %v567_v15  ;;  %v1368_v34 = vpop.eup %1367  ;;  %v486_v4 = vmax.f32 %v1993_v3, %v485_v63 }
 0x15d   : > { %619 = vperm.xlu1 %1356, %v611_v18   ;;  %v574_v35 = vmul.f32 %v1368_v34, %v571_v33  ;;  %v1370_v42 = vpop.eup %1369 }
 0x15e   : > { %577 = vperm.xlu2 %1355, %v570_v20   ;;  %v614_v51 = vrot.slane %v1370_v42, 1 }
 0x15f   : > { %v580_v36 = vperm.slane %v574_v35, 2 }
 0x160   : > { %v616_v54 = vmul.f32 %v614_v51, %v473_v29 }
 0x162   : > { %v622_v57 = vperm.slane %v616_v54, 2 }
 0x165   : > { %1358 = vset.pattern.permute.xlu1 %v1719_v24  ;;  %v1362_v24 = vld [vmem:[%s457_s29] ss:$0 sm:$0xff] }
 0x166   : > { %515 = vperm.xlu2 %1355, %v508_v23   ;;  %490 = vperm.xlu1 %1358, %v1946_v0  }
 0x16e   : > { %476 = vperm.xlu2 %1355, %v1946_v0   ;;  %1360 = vset.pattern.permute.xlu1 %v1720_v25  ;;  %v525_v25 = vmin.f32 %v1993_v3, %v485_v63 }
 0x16f   : > { %551 = vperm.xlu1 %1360, %v1946_v0  }
 0x176   : > { %1359 = vset.pattern.permute.xlu2 %v1721_v26  ;;  %v534_v26 = vrot.slane %v1972_v27, 2 }
 0x177   : > { %496 = vperm.xlu2 %1359, %v1946_v0  }
 0x178   : > { %v536_v34 = vadd.f32 %v534_v26, %v1972_v27 }
 0x1b8   : > { %v578_v37 = vpop.permute.xlu2 %577 }
 0x1b9   : > { %v583_v38 = vmax.f32 %v578_v37, %v580_v36  ;;  %v581_v40 = vsub.f32 %v578_v37, %v580_v36  ;;  %v540_v37 = vperm.slane %v536_v34, 1 }
 0x1bb   : > { %1371 = vrcp.f32 %v583_v38  ;;  %v582_v43 = vand.u32 2147483647, %v581_v40  ;;  %v537_v40 = vperm.slane %v536_v34, 0 }
 0x1c0   : > { %v516_v44 = vpop.permute.xlu2 %515 }
 0x1c1   : > { %v1372_v45 = vpop.eup %1371  ;;  %v519_v46 = vadd.f32 %v518_v41, %v516_v44  ;;  %v596_v47 = vmax.f32 %v516_v44, %v518_v41  ;;  %v594_v49 = vsub.f32 %v516_v44, %v518_v41 }
 0x1c2   : > { %v1976_v48 = vmul.f32 %v1372_v45, %v582_v43 }
 0x1c3   : > { %1373 = vrcp.f32 %v596_v47  ;;  %v595_v53 = vand.u32 2147483647, %v594_v49  ;;  %v538_v47 = vsub.f32 %v537_v40, %v1993_v3 }
 0x1c4   : > { %v586_v50 = vsub.f32 1.0, %v1976_v48 }
 0x1c6   : > { %v588_v52 = vsel %vm587_vm2, %v586_v50, -inf }
 0x1c7   : > { %589 = vmax.xlane.f32.xlu2 %v588_v52 }
 0x1c8   : > { %v1985_v59 = vpop.permute.xlu2 %476 }
 0x1c9   : > { %v1374_v55 = vpop.eup %1373  ;;  %v480_v5 = vmin.f32 %v1985_v59, %v479_v1  ;;  %v524_v28 = vmax.f32 %v1985_v59, %v479_v1  ;;  %v539_v52 = vsub.f32 %v538_v47, %v1985_v59 }
 0x1ca   : > { %v1982_v56 = vmul.f32 %v1374_v55, %v595_v53 }
 0x1cb   : > { %v487_v14 = vsub.f32 %v480_v5, %v486_v4  ;;  %v526_v35 = vsub.f32 %v524_v28, %v525_v25  ;;  %v543_v55 = vmul.f32 %v539_v52, %v539_v52 }
 0x1cc   : > { %v599_v58 = vsub.f32 1.0, %v1982_v56 }
 0x1cd   : > { %v488_v19 = vmax.f32 %v487_v14, 0.0  ;;  %v530_v41 = vmul.f32 %v526_v35, %v526_v35 }
 0x1ce   : > { %v600_v60 = vsel %vm587_vm2, %v599_v58, -inf }
 0x1cf   : > { %v620_v61 = vpop.permute.xlu1 %619  ;;  %601 = vmax.xlane.f32.xlu1 %v600_v60 }
 0x1d0   : > { %v624_v62 = vmax.f32 %v620_v61, %v622_v57  ;;  %v623_v11 = vmin.f32 %v620_v61, %v622_v57 }
 0x1d1   : > { %v1998_v7 = vpop.permute.xlu2 %496 }
 0x1d2   : > { %1375 = vrcp.f32 %v624_v62  ;;  %v500_v8 = vmax.f32 %v1998_v7, %v499_v2  ;;  %v528_v20 = vmin.f32 %v1998_v7, %v499_v2  ;;  %v541_v42 = vsub.f32 %v540_v37, %v1998_v7 }
 0x1d8   : > { %v1376_v9 = vpop.eup %1375  ;;  %v2001_v12 = vpop.permute.xlu1 %490 }
 0x1d9   : > { %v494_v15 = vmin.f32 %v2001_v12, %v493_v6  ;;  %v2004_v16 = vmul.f32 %v1376_v9, %v623_v11  ;;  %v527_v23 = vmax.f32 %v2001_v12, %v493_v6  ;;  %v542_v51 = vsub.f32 %v541_v42, %v2001_v12 }
 0x1da   : > { %v1722_v6 = vmov 3.0  }
 0x1db   : > { %v501_v17 = vsub.f32 %v494_v15, %v500_v8  ;;  %v627_v18 = vsel %vm587_vm2, %v2004_v16, -inf  ;;  %v529_v30 = vsub.f32 %v527_v23, %v528_v20  ;;  %v544_v54 = vmul.f32 %v542_v51, %v542_v51 }
 0x1dc   : > { %628 = vmax.xlane.f32.xlu0 %v627_v18 }
 0x1dd   : > { %v502_v22 = vmax.f32 %v501_v17, 0.0  ;;  %v531_v38 = vmul.f32 %v529_v30, %v529_v30  ;;  %v545_v57 = vadd.f32 %v544_v54, %v543_v55 }
 0x1df   : > { %v503_v29 = vmul.f32 %v502_v22, %v488_v19  ;;  %v532_v43 = vadd.f32 %v531_v38, %v530_v41  ;;  %v546_v62 = vmul.f32 0.25, %v545_v57  ;;  %v461_v22 = vld [vmem:[#allocation7] sm:$0x3] }
 0x1e0   : > { %v683_v25 = vperm.slane %v461_v22, 0 }
 0x1e1   : > { %v552_v31 = vpop.permute.xlu1 %551  ;;  %v520_v32 = vsub.f32 %v519_v46, %v503_v29  ;;  %v533_v46 = vadd.f32 1e-07, %v532_v43 }
 0x1e2   : > { %v554_v33 = vsub.f32 %v1362_v24, %v552_v31  ;;  %v685_v24 = vperm.slane %v461_v22, 1  ;;  %v684_v31 = vsub.f32 %v683_v25, %v1993_v3  ;;  %v688_v35 = vsub.f32 %v1985_v59, %v683_v25  ;;  %v675_v59 = vpop.f32.mrf.mxu0 }
 0x1e3   : > { %v521_v36 = vadd.f32 1e-07, %v520_v32 }
 0x1e4   : > { %v555_v39 = vmul.f32 %v554_v33, %v554_v33  ;;  %v686_v32 = vsub.f32 %v685_v24, %v1998_v7  ;;  %v689_v33 = vsub.f32 %v2001_v12, %v685_v24 }
 0x1e5   : > { %1377 = vrcp.f32 %v521_v36 }
 0x1e6   : > { %v556_v44 = vmul.f32 0.40528473, %v555_v39  ;;  %1379 = vrcp.f32 %v533_v46  ;;  %v687_v40 = vmin.f32 %v684_v31, %v686_v32  ;;  %v690_v41 = vmin.f32 %v688_v35, %v689_v33 }
 0x1eb   : > { %v1378_v45 = vpop.eup %1377 }
 0x1ec   : > { %v523_v49 = vmul.f32 %v1378_v45, %v503_v29  ;;  %v1380_v60 = vpop.eup %1379 }
 0x1ed   : > { %v562_v2 = vmul.f32 %v1380_v60, %v546_v62 }
 0x1ee   : > { %v557_v27 = vsub.f32 %v556_v44, %v523_v49 }
 0x1f0   : > { %v558_v53 = vadd.f32 1.0000001, %v557_v27  ;;  %v1698_v27 = vmov 0.0  }
 0x1f2   : > { %1381 = vrcp.f32 %v558_v53 }
 0x1f3   : > { %1383 = vrcp.f32 %v1722_v6 }
 0x1f8   : > { %v1382_v61 = vpop.eup %1381 }
 0x1f9   : > { %v560_v63 = vmul.f32 %v1382_v61, %v556_v44  ;;  %v1384_v8 = vpop.eup %1383 }
 0x1fa   : > { %v636_v15 = vmul.f32 3.0, %v1384_v8  ;;  %vm640_vm3 = vweird.f32 %v1384_v8 }
 0x1fb   : > { %v563_v1 = vmul.f32 %v560_v63, %v556_v44  ;;  %v691_v44 = vmin.f32 %v687_v40, %v690_v41 }
 0x1fc   : > { %v637_v19 = vsub.f32 1.0, %v636_v15 }
 0x1fd   : > { %v564_v4 = vadd.f32 %v563_v1, %v562_v2  ;;  %vm692_vm4 = vcmp.gt.f32.partialorder %v691_v44, 1e-09 }
 0x1fe   : > { %v638_v26 = vmul.f32 %v1384_v8, %v637_v19  ;;  %v2040_v56 = vsel %vm692_vm4, 1.0, %v1718_v21 }
 0x1ff   : > { %v565_v5 = vsub.f32 %v523_v49, %v564_v4 }
 0x200   : > { %v639_v36 = vadd.f32 %v1384_v8, %v638_v26 }
 0x201   : > { %v2023_v23 = vmax.f32 %v565_v5, 0.0 }
 0x202   : > { %v641_v7 = vsel %vm640_vm3, %v1384_v8, %v639_v36 }
 0x203   : > { %v678_v28 = vmul.f32 %v2023_v23, %v2023_v23 }
 0x205   : > { %v679_v37 = vmul.f32 %v678_v28, %v678_v28 }
 0x207   : > { %v680_v12 = vmul.f32 %v679_v37, %v678_v28 }
 0x23a   : > { %v590_v9 = vpop.xlane.xlu2 %589 }
 0x23b   : > { %v591_v14 = vadd.f32 1e-07, %v590_v9 }
 0x23d   : > { %1385 = vrcp.f32 %v591_v14 }
 0x242   : > { %v602_v11 = vpop.xlane.xlu1 %601 }
 0x243   : > { %v603_v17 = vadd.f32 1e-07, %v602_v11  ;;  %v1386_v29 = vpop.eup %1385 }
 0x244   : > { %v593_v38 = vmul.f32 %v1386_v29, %v586_v50  ;;  %v681_v50 = vmul.f32 %v680_v12, %v675_v59 }
 0x245   : > { %1387 = vrcp.f32 %v603_v17 }
 0x24b   : > { %v1388_v30 = vpop.eup %1387 }
 0x24c   : > { %v605_v3 = vmul.f32 %v1388_v30, %v599_v58  ;;  %v697_v58 = vsub.s32 63, %v1955_v13 }
 0x24f   : > { %v629_v18 = vpop.xlane.xlu0 %628 }
 0x250   : > { %v630_v20 = vadd.f32 1e-07, %v629_v18 }
 0x252   : > { %1389 = vrcp.f32 %v630_v20 }
 0x258   : > { %v1390_v34 = vpop.eup %1389 }
 0x259   : > { %v632_v39 = vmul.f32 %v1390_v34, %v2004_v16 }
 0x25b   : > { %v633_v42 = vadd.f32 %v632_v39, %v593_v38 }
 0x25d   : > { %v634_v43 = vadd.f32 %v633_v42, %v605_v3 }
 0x25f   : > { %v642_v48 = vmul.f32 %v641_v7, %v634_v43 }
 0x261   : > { %v643_v45 = vmax.f32 %v642_v48, 0.0 }
 0x263   : > { %v2036_v16 = vmul.f32 %v681_v50, %v643_v45 }
 0x265   : > { %v695_v47 = vmax.f32 %v2036_v16, 0.0 }
 0x267   : > { %v696_v49 = vmul.f32 %v2040_v56, %v695_v47 }
 0x269   : > { %v699_v46 = vand.u32 4294967232, %v696_v49 }
 0x26b   : > { %v700_v51 = vor.u32 %v699_v46, %v697_v58  }
 0x26d   : > { %v1702_v52 = vmov %v700_v51  }
 0x26e LB: >> { %v709_v13 = vsel %vm587_vm2, %v1704_v52, 2147483648  ;;  %v1723_v5 = vmov 0.0   ;;  %s706_s2 = sadd.s32 1, %s1708_s2   ;;  %s1708_s2 = sphi %s2054_s2, %s706_s2   ;;  %v1704_v52 = vphi %v1702_v52, %v725_v52   ;;  %v1700_v27 = vphi %v1698_v27, %v1699_v27  }
 0x26f   : >> { %v711_v53 = vshra.s32 %v709_v13, 16  ;;  %v710_v55 = vand.u32 65535, %v709_v13  ;;  %p703_p6 = scmp.ge.s32.totalorder %s706_s2, 13  }
 0x270   : > { %v1724_v9 = vmov (%p703_p6), 5   ;;  %v744_v11 = vsel (%p703_p6), %vm587_vm2, %v2023_v23, -inf  ;;  %v2065_v22 = vshrl.u32 (%p703_p6), %v644_v10, 7  ;;  %vm888_vm14 = vcmask (%p703_p6), 516096   ;;  %s957_s21 = scalar_lea.hbm (%p703_p6), %s2216_s8, %s1793_s9  ;;  %s959_s11 = sshll.u32 (%p703_p6), %s454_s18, 4  ;;  %s960_s11 = int_to_ptr.vmem [resolvable:$true] %s959_s11 }
 0x271   : >> { %v713_v54 = vcvt.s32.f32 %v711_v53  ;;  %v712_v57 = vcvt.s32.f32 %v710_v55  ;;  %1391 = vset.pattern.permute.xlu0 (%p703_p6), %v1724_v9  ;;  %v745_v14 = vrot.slane (%p703_p6), %v744_v11, 4  ;;  %vm816_vm0 = vcmask (%p703_p6), 64512   ;;  %s961_s23 = sshll.u32 (%p703_p6), %s957_s21, 4  ;;  %s905_s24 = scalar_lea.sflag (%p703_p6), [#allocation15], %s1912_s0  ;;  %s962_s23 = int_to_ptr.hbm [resolvable:$true] %s961_s23 }
 0x272   : > { %vm777_vm13 = vcmp.eq.s32.totalorder (%p703_p6), %v2065_v22, 0  ;;  %s1528_s22 = sshra.s32 (%p703_p6), %s962_s23, 4  ;;  %s1534_s5 = scalar_lea.hbm (%p703_p6), %s2216_s8, 2  ;;  %s1529_s22 = int_to_ptr.hbm [resolvable:$true] %s1528_s22 }
 0x273   : >> { %714 = vmax.xlane.f32.xlu0 %v713_v54  ;;  %v746_v15 = vmax.f32 (%p703_p6), %v744_v11, %v745_v14  ;;  %s1530_s15 = scalar_lea.hbm (%p703_p6), %s1529_s22, 1  ;;  %p1535_p0 = scmp.lt.s32.totalorder (%p703_p6), %s1529_s22, %s2216_s8 }
 0x274   : > { %p1531_p13 = scmp.ne.s32.totalorder (%p703_p6), %s1529_s22, %s1530_s15  ;;  %p1536_p5 = scmp.lt.s32.totalorder (%p703_p6), %s1534_s5, %s1530_s15 }
 0x275   : > { %v747_v17 = vrot.slane (%p703_p6), %v746_v15, 2 }
 0x276   : > { %p1532_p7 = pnand (%p703_p6), %p1531_p13, %p1826_p11  ;;  %p1537_p9 = por (%p703_p6), %p1536_p5, %p1535_p0 }
 0x277   : > { %v748_v18 = vmax.f32 (%p703_p6), %v746_v15, %v747_v17 }
 0x278   : > { %p1533_p8 = pneg (%p703_p6), %p1532_p7 }
 0x279   : > { %v749_v19 = vrot.slane (%p703_p6), %v748_v18, 1 }
 0x27a   : > { %p1538_p10 = pnand (%p703_p6), %p1537_p9, %p1533_p8 }
 0x27b   : > { %v750_v20 = vmax.f32 (%p703_p6), %v748_v18, %v749_v19 }
 0x27d   : > { %vm751_vm7 = vcmp.eq.f32.partialorder (%p703_p6), %v2023_v23, %v750_v20 }
 0x27e   : > { %v752_v24 = vsel (%p703_p6), %vm751_vm7, %v2065_v22, 8 }
 0x27f   : > { %v753_v25 = vsel (%p703_p6), %vm587_vm2, %v752_v24, 2147483647 }
 0x280   : > { %v754_v26 = vrot.slane (%p703_p6), %v753_v25, 4 }
 0x282   : > { %vm755_vm8 = vcmp.lt.s32.totalorder (%p703_p6), %v753_v25, %v754_v26 }
 0x2e6   : >> { %v715_v60 = vpop.xlane.xlu0 %714 }
 0x2e7   : >> { %vm716_vm5 = vcmp.eq.f32.partialorder %v713_v54, %v715_v60  ;;  %v721_v62 = vcvt.f32.s32 %v715_v60 }
 0x2e8   : >> { %v717_v61 = vsel %vm716_vm5, %v712_v57, -inf }
 0x2e9   : >> { %718 = vmax.xlane.f32.xlu0 %v717_v61  ;;  %v722_v1 = vshll.u32 %v721_v62, 16 }
 0x2fd   : > { %731 = vperm.xlu0 (%p703_p6), %1391, %v1946_v0  }
 0x31f   : > { %784 = vxpose.xlu0.b32.start.end [1/1] (short) (narrow) (%p703_p6), %v1946_v0, 8  ;;  %v756_v0 = vsel (%p703_p6), %vm755_vm8, %v753_v25, %v754_v26 }
 0x320   : > { %v757_v28 = vrot.slane (%p703_p6), %v756_v0, 2 }
 0x322   : > { %vm758_vm9 = vcmp.lt.s32.totalorder (%p703_p6), %v756_v0, %v757_v28 }
 0x323   : > { %v759_v30 = vsel (%p703_p6), %vm758_vm9, %v756_v0, %v757_v28 }
 0x324   : > { %v760_v32 = vrot.slane (%p703_p6), %v759_v30, 1 }
 0x326   : > { %vm761_vm10 = vcmp.lt.s32.totalorder (%p703_p6), %v759_v30, %v760_v32 }
 0x327   : > { %v762_v36 = vsel (%p703_p6), %vm761_vm10, %v759_v30, %v760_v32 }
 0x328   : > { %vm763_vm11 = vcmp.eq.s32.totalorder (%p703_p6), %v2065_v22, %v762_v36 }
 0x329   : > { %v1215_v40 = vsel (%p703_p6), %vm763_vm11, 1.0, %v1718_v21 }
 0x35c   : >> { %v719_v63 = vpop.xlane.xlu0 %718 }
 0x35d   : >> { %v720_v2 = vcvt.f32.s32 %v719_v63 }
 0x35f   : >> { %v723_v4 = vadd.s32 %v722_v1, %v720_v2 }
 0x361   : >> { %vm724_vm6 = vcmp.eq.s32.totalorder %v1704_v52, %v723_v4  ;;  %705 = sbr.rel (!%p703_p6) target bundleno = 622 (0x26e), region = 174 }
 0x362   : >> { %v725_v52 = vsel %vm724_vm6, 2147483648, %v1704_v52   ;;  %v1214_v6 = vsel %vm724_vm6, 1.0, %v1723_v5 }
 0x363   : >> { %v728_v8 = vadd.f32 %v1700_v27, %v1214_v6  }
 0x365   : >> { %v1699_v27 = vmov %v728_v8   ;;  %v729_v29 = vmul.f32 (%p703_p6), %v2040_v56, %v728_v8  ;;  %v1216_v56 = vsel (%p703_p6), %vm777_vm13, 1.0, %v1718_v21 }
 0x36f   : > { %v732_v31 = vpop.permute.xlu0 %731 }
 0x370   : > { %v734_v33 = vmul.f32 %v732_v31, %v729_v29 }
 0x372   : > { %v735_v10 = vsel %vm587_vm2, %v734_v33, 0.0 }
 0x373   : > { %v736_v34 = vrot.slane %v735_v10, 4 }
 0x375   : > { %v737_v35 = vadd.f32 %v736_v34, %v735_v10 }
 0x377   : > { %v738_v37 = vrot.slane %v737_v35, 2 }
 0x379   : > { %v739_v38 = vadd.f32 %v738_v37, %v737_v35 }
 0x37b   : > { %v740_v39 = vrot.slane %v739_v38, 1 }
 0x37d   : > { %v741_v41 = vadd.f32 %v740_v39, %v739_v38 }
 0x37f   : > { %vm766_vm12 = vcmp.gt.f32.partialorder %v741_v41, 1.0 }
 0x380   : > { %v769_v3 = vsel %vm766_vm12, %v1215_v40, %v734_v33 }
 0x381   : > { %v845_v42 = vmul.f32 %v769_v3, %v2036_v16  ;;  %v770_v7 = vsel %vm587_vm2, %v769_v3, 0.0  ;;  %v849_v48 = vmul.f32 %v769_v3, %v2023_v23 }
 0x382   : > { %v771_v12 = vrot.slane %v770_v7, 4 }
 0x383   : > { %v846_v43 = vsel %vm587_vm2, %v845_v42, -inf  ;;  %v850_v47 = vsel %vm587_vm2, %v849_v48, -inf }
 0x384   : > { %847 = vmax.xlane.f32.xlu1 %v846_v43  ;;  %v772_v59 = vadd.f32 %v771_v12, %v770_v7 }
 0x386   : > { %v773_v44 = vrot.slane %v772_v59, 2 }
 0x388   : > { %v774_v50 = vadd.f32 %v773_v44, %v772_v59 }
 0x38a   : > { %v775_v45 = vrot.slane %v774_v50, 1 }
 0x38c   : > { %851 = vmax.xlane.f32.xlu1 %v850_v47  ;;  %v2080_v16 = vadd.f32 %v775_v45, %v774_v50 }
 0x38e   : > { %vm780_vm15 = vcmp.gt.f32.partialorder %v2080_v16, 0.0  ;;  %889 = vst.msk [vmem:[%s454_s18] sm:$0x1] %vm888_vm14, %v2080_v16 }
 0x38f   : > { %v783_v23 = vsel %vm780_vm15, %v769_v3, %v1216_v56 }
 0x390   : > { %835 = vmatpush.msra.mxu1 %v783_v23 }
 0x3c3   : > { %v800_v58 = vpop.trf.xlu0 }
 0x3c4   : > { %1217 = vmatmul.msk.f32.vlgmr.msra.gmra.mxu1 %vm816_vm0, %v800_v58 }
 0x3c5   : > { %1541 = shalt.err (!%p1538_p10)
}
 0x3c6   : > { %1245 = dma.vmem_to_hbm [thread:$0]  (%p1826_p11), %s960_s11, 16, %s962_s23, %s905_s24   ;;  %v878_v9 = vadd.s32 8, %v2065_v22  ;;  %vm840_vm6 = vcmask 519168   ;;  %v879_v14 = vcvt.s32.f32 %v2065_v22 }
 0x3c7   : > { %s1220_s27 = sshll.u32 %s1793_s9, 2  ;;  %s1226_s25 = sshll.u32 %s1793_s9, 4 }
 0x3c8   : > { %s927_s2 = scalar_lea.hbm %s2214_s6, %s1220_s27  ;;  %s929_s26 = sshll.u32 %s2047_s10, 4  ;;  %v880_v15 = vcvt.s32.f32 %v878_v9  ;;  %s930_s26 = int_to_ptr.vmem [resolvable:$true] %s929_s26 }
 0x3c9   : > { %s931_s21 = sshll.u32 %s927_s2, 4  ;;  %s2242_s24 = sld [smem:[#allocation30_spill]]  ;;  %s932_s21 = int_to_ptr.hbm [resolvable:$true] %s931_s21 }
 0x3ca   : > { %s2243_s16 = sld [smem:[#allocation31_spill]]  ;;  %s2126_s7 = sshll.u32 %s434_s12, 4  ;;  %s916_s7 = int_to_ptr.vmem [resolvable:$true] %s2126_s7 }
 0x3cb   : > { %s943_s27 = sshll.u32 %s2051_s14, 4  ;;  %s2135_s18 = scalar_lea.sflag [#allocation12], %s376_s19  ;;  %s2155_s27 = int_to_ptr.vmem [resolvable:$true] %s943_s27 }
 0x3cc   : > { %s1556_s2 = sshra.s32 %s932_s21, 4  ;;  %s1557_s2 = int_to_ptr.hbm [resolvable:$true] %s1556_s2 }
 0x3cd   : > { %p1563_p4 = scmp.lt.s32.totalorder %s1557_s2, %s2214_s6 }
 0x3cf   : > { %s913_s22 = scalar_lea.hbm %s2242_s24, %s1793_s9 }
 0x3d0   : > { %s2121_s5 = scalar_lea.hbm %s2243_s16, %s1226_s25  ;;  %s2128_s29 = sshll.u32 %s913_s22, 4  ;;  %s918_s29 = int_to_ptr.hbm [resolvable:$true] %s2128_s29 }
 0x3d1   : > { %s945_s20 = sshll.u32 %s2121_s5, 4  ;;  %s1558_s25 = scalar_lea.hbm %s1557_s2, 4  ;;  %s2157_s20 = int_to_ptr.hbm [resolvable:$true] %s945_s20 }
 0x3d2   : > { %p1559_p1 = scmp.ne.s32.totalorder %s1557_s2, %s1558_s25  ;;  %s1562_s22 = scalar_lea.hbm %s2214_s6, 8 }
 0x3d3   : > { %p1564_p6 = scmp.lt.s32.totalorder %s1562_s22, %s1558_s25 }
 0x3d4   : > { %p1560_p2 = pnand %p1559_p1, %p1826_p11 }
 0x3d5   : > { %p1565_p13 = por %p1564_p6, %p1563_p4 }
 0x3d6   : > { %p1561_p3 = pneg %p1560_p2 }
 0x3d8   : > { %p1566_p7 = pnand %p1565_p13, %p1561_p3 }
 0x3f7   : > { %v848_v21 = vpop.xlane.xlu1 %847 }
 0x3f8   : > { %v853_v49 = vadd.f32 1e-09, %v848_v21 }
 0x3fa   : > { %1392 = vrcp.f32 %v853_v49  ;;  %v865_v53 = vand.u32 2147483648, %v853_v49  ;;  %vm859_vm3 = vweird.f32 %v853_v49  ;;  %v863_v54 = vand.u32 2147483647, %v853_v49 }
 0x3fc   : > { %v866_v57 = vor.u32 1.1754944e-38, %v865_v53  ;;  %vm864_vm5 = vcmp.eq.f32.partialorder %v863_v54, 8.507059e+37 }
 0x3ff   : > { %v852_v61 = vpop.xlane.xlu1 %851 }
 0x400   : > { %v1393_v46 = vpop.eup %1392 }
 0x401   : > { %v855_v51 = vmul.f32 %v1393_v46, %v853_v49  ;;  %vm860_vm1 = vweird.f32 %v1393_v46 }
 0x402   : > { %vm861_vm4 = vmor %vm859_vm3, %vm860_vm1 }
 0x403   : > { %v856_v27 = vsub.f32 1.0, %v855_v51 }
 0x405   : > { %v857_v52 = vmul.f32 %v1393_v46, %v856_v27 }
 0x407   : > { %v858_v13 = vadd.f32 %v1393_v46, %v857_v52 }
 0x409   : > { %v862_v55 = vsel %vm861_vm4, %v1393_v46, %v858_v13 }
 0x40a   : > { %v867_v60 = vsel %vm864_vm5, %v866_v57, %v862_v55 }
 0x40b   : > { %v868_v62 = vmul.f32 %v867_v60, %v852_v61 }
 0x40d   : > { %v869_v63 = vmul.f32 %v868_v62, %v845_v42 }
 0x40f   : > { %v870_v1 = vsel %vm587_vm2, %v869_v63, -inf }
 0x410   : > { %v871_v2 = vrot.slane %v870_v1, 4 }
 0x412   : > { %v872_v4 = vmax.f32 %v870_v1, %v871_v2 }
 0x414   : > { %v873_v5 = vrot.slane %v872_v4, 2 }
 0x416   : > { %v874_v6 = vmax.f32 %v872_v4, %v873_v5 }
 0x418   : > { %v875_v8 = vrot.slane %v874_v6, 1 }
 0x41a   : > { %v876_v11 = vmax.f32 %v874_v6, %v875_v8 }
 0x441   : > { %v837_v17 = vpop.f32.mrf.mxu1 }
 0x442   : > { %vm1227_vm7 = vcmp.lt.s32.totalorder %v837_v17, 0  ;;  %v1228_v18 = vceil.f32 %v837_v17  ;;  %v1229_v19 = vfloor.f32 %v837_v17  ;;  %v881_v20 = vperm.slane %v837_v17, 4  ;;  %841 = vst.msk [vmem:[%s2047_s10] sm:$0xf] %vm840_vm6, %v837_v17 }
 0x443   : > { %1569 = shalt.err (!%p1566_p7)
}
 0x444   : > { %1243 = dma.vmem_to_hbm [thread:$0]  (%p1826_p11), %s930_s26, 64, %s932_s21, %s2135_s18   ;;  %v877_v22 = vsel %vm780_vm15, %v876_v11, 0.0  ;;  %vm882_vm8 = vcmp.eq.f32.partialorder %v879_v14, %v881_v20  ;;  %vm883_vm9 = vcmp.eq.f32.partialorder %v880_v15, %v881_v20  ;;  %v1230_v24 = vsel %vm1227_vm7, %v1228_v18, %v1229_v19 }
 0x445   : > { %v884_v25 = vsel %vm882_vm8, %v877_v22, 0.0  ;;  %v885_v26 = vsel %vm883_vm9, %v877_v22, 0.0  ;;  %v1231_v0 = vcvt.f32.s32 %v1230_v24  ;;  %vm843_vm10 = vcmask 520196   ;;  %s891_s9 = scalar_lea.sflag [#allocation4], %s1912_s0  ;;  %s1584_s19 = sshra.s32 %s918_s29, 4  ;;  %s1585_s19 = int_to_ptr.hbm [resolvable:$true] %s1584_s19 }
 0x446   : > { %886 = vst.msk [vmem:[%s2051_s14] sm:$0xff] %vm587_vm2, %v884_v25  ;;  %s1586_s10 = scalar_lea.hbm %s1585_s19, 1  ;;  %s1590_s5 = scalar_lea.hbm %s2242_s24, 2 }
 0x447   : > { %887 = vst.msk [vmem:[%s2051_s14 + $0x8] sm:$0xff] %vm587_vm2, %v885_v26  ;;  %p1587_p8 = scmp.ne.s32.totalorder %s1585_s19, %s1586_s10  ;;  %p1591_p9 = scmp.lt.s32.totalorder %s1585_s19, %s2242_s24 }
 0x448   : > { %844 = vst.msk [vmem:[%s434_s12 - $0x4] sm:$0x10] %vm843_vm10, %v1231_v0  ;;  %p1592_p10 = scmp.lt.s32.totalorder %s1590_s5, %s1586_s10 }
 0x449   : > { %p1588_p0 = pnand %p1587_p8, %p1826_p11 }
 0x44a   : > { %p1593_p1 = por %p1592_p10, %p1591_p9 }
 0x44b   : > { %p1589_p5 = pneg %p1588_p0 }
 0x44d   : > { %p1594_p2 = pnand %p1593_p1, %p1589_p5 }
 0x44f   : > { %1597 = shalt.err (!%p1594_p2)
}
 0x450   : > { %1242 = dma.vmem_to_hbm [thread:$0]  (%p1826_p11), %s916_s7, 16, %s918_s29, %s891_s9  }
 0x451   : > { %s1612_s0 = sshra.s32 %s2157_s20, 4  ;;  %s1618_s23 = scalar_lea.hbm %s2243_s16, 32  ;;  %s1613_s0 = int_to_ptr.hbm [resolvable:$true] %s1612_s0 }
 0x452   : > { %s1614_s12 = scalar_lea.hbm %s1613_s0, 16  ;;  %p1619_p13 = scmp.lt.s32.totalorder %s1613_s0, %s2243_s16 }
 0x453   : > { %p1615_p3 = scmp.ne.s32.totalorder %s1613_s0, %s1614_s12  ;;  %p1620_p7 = scmp.lt.s32.totalorder %s1618_s23, %s1614_s12 }
 0x455   : > { %p1616_p4 = pnand %p1615_p3, %p1826_p11  ;;  %p1621_p8 = por %p1620_p7, %p1619_p13 }
 0x457   : > { %p1617_p6 = pneg %p1616_p4 }
 0x459   : > { %p1622_p0 = pnand %p1621_p8, %p1617_p6 }
 0x45b   : > { %1625 = shalt.err (!%p1622_p0)
}
 0x45c   : > { %s1725_s7 = smov 128   ;;  %s1726_s29 = smov 8  }
 0x45d   : > { %1244 = dma.vmem_to_hbm [thread:$0]  (%p1826_p11), %s2155_s27, 256, %s2157_s20, %s2135_s18, %s1725_s7, %s1725_s7, %s1726_s29  }
 0x45e PF: > { %s2244_s13 = sld [smem:[#allocation23_spill]]  ;;  %p2246_p5 = scmp.ge.s32.totalorder %s1696_s30, 2 }
 0x460   : > { %p1265_p9 = pnand %p2246_p5, %p1830_p12 }
 0x462   : > { %p1266_p10 = pneg %p1265_p9 }
 0x464   : > { %s973_s19 = sand.u32 1, %s2244_s13  }
 0x465   : > { %s974_s10 = scalar_lea.sflag [#allocation4], %s973_s19 }
 0x466   : > { %1671 = dma.done.wait (%p1266_p10), %s974_s10, 16  }
 0x467   : > { %1673 = vsyncadd (%p1266_p10), %s974_s10, 4294967280  ;;  %s2247_s26 = sadd.s32 4294967294, %s1696_s30  }
 0x468   : > { %s982_s21 = sand.u32 1, %s2247_s26  }
 0x469   : > { %s983_s5 = scalar_lea.sflag [#allocation12], %s982_s21 }
 0x46a   : > { %1675 = dma.done.wait (%p1266_p10), %s983_s5, 320  }
 0x46b   : > { %1677 = vsyncadd (%p1266_p10), %s983_s5, 4294966976  ;;  %s1003_s17 = scalar_lea.sflag [#allocation15], %s973_s19 }
 0x46c   : > { %1679 = dma.done.wait (%p1266_p10), %s1003_s17, 16  }
 0x46d   : > { %1681 = vsyncadd (%p1266_p10), %s1003_s17, 4294967280  ;;  %s2248_s30 = sld [smem:[#allocation25_spill]]  ;;  %s2251_s27 = smov %s1688_s28 }
 0x46e   : > { %s2249_s20 = sld [smem:[#allocation24_spill]] }
 0x46f   : > { %s2250_s29 = sld [smem:[#allocation26_spill]] }
 0x473   : > { %p34_p11 = scmp.ge.s32.totalorder %s2248_s30, 4  }
 0x474   : > { %s2252_s28 = smov %s2249_s20 }
 0x475   :  { %36 = sbr.rel (!%p34_p11) target bundleno = 18 (0x12), region = 185 }
 0x47a   :  { %1008 = vsyncpa [#allocation3], 1 }
 0x47b   :  { %1010 = vsyncpa [#allocation3 + $0x1], 1 }
 0x47c   :  { %1011 = vsyncpa [#allocation6], 1 }
 0x47d   :  { %1013 = vsyncpa [#allocation6 + $0x1], 1 }
 0x47e   :  { %1014 = vsyncpa [#allocation9], 1 }
 0x47f   :  { %1016 = vsyncpa [#allocation9 + $0x1], 1 }
 0x480   :  { %1017 = vsyncpa [#allocation4], 1 }
 0x481   :  { %1019 = vsyncpa [#allocation4 + $0x1], 1 }
 0x482   :  { %1020 = vsyncpa [#allocation12], 1 }
 0x483   :  { %1022 = vsyncpa [#allocation12 + $0x1], 1 }
 0x484   :  { %1023 = vsyncpa [#allocation15], 1 }
 0x485   :  { %1025 = vsyncpa [#allocation15 + $0x1], 1 }

</bundles_post_ra>
